<compile_context>
chip_gen: v6e
topology: v6e:2x2x1
jax: 0.10.0
libtpu: 0.0.40
codegen_flags: <defaults>
</compile_context>

<pallas_src>
import math

import jax
import jax.numpy as jnp
from jax.experimental import pallas as pl
from jax.experimental.pallas import tpu as pltpu

INPUT_DIM = 2
TIME_EMB_DIM = 16
HALF_DIM = TIME_EMB_DIM // 2
HIDDEN = 128
XT_ROWS = 8        # packed input rows: [t, x0, x1, 0, 0, 0, 0, 0]
OUT_ROWS = 8       # padded output rows: [y0, y1, 0, ..., 0]
LANE_MIN = 128     # lane (batch) tiling granularity
TB_MAX = 1024      # max batch columns per grid step


def fnn_kernel(xt_ref, freq_ref, phase_ref,
               w1x_ref, w1e_ref, b1_ref,
               w2_ref, b2_ref, w3_ref, b3_ref,
               w4_ref, b4_ref, o_ref):
    # --- packed input: row 0 = t, rows 1-2 = x, rows 3-7 = 0 -------------------
    xt = xt_ref[...]                                           # (8, TB)  f32
    t = xt[0:1, :]                                             # (1, TB)

    # --- sinusoidal time embedding, feature-major (16, TB), one transcendental --
    #   rows [0,8)  : sin(t * f_k)                     (phase 0)
    #   rows [8,16) : cos(t * f_k) = sin(t*f_k + pi/2)
    emb = jnp.sin(freq_ref[...] * t + phase_ref[...])          # (16, TB) f32

    # --- fc1: two tiny f32 matmuls (K=16 embedding part, K=8 packed-x part) -----
    h = jnp.dot(w1e_ref[...], emb, preferred_element_type=jnp.float32)   # (128, TB)
    h = h + jnp.dot(w1x_ref[...], xt, preferred_element_type=jnp.float32)
    h = jnp.maximum(h + b1_ref[...], 0.0)

    # --- fc2 / fc3 (ReLU) and fc4 (linear): bf16 MXU operands, f32 epilogue -----
    h = jnp.maximum(jnp.dot(w2_ref[...], h.astype(jnp.bfloat16),
                            preferred_element_type=jnp.float32) + b2_ref[...], 0.0)
    h = jnp.maximum(jnp.dot(w3_ref[...], h.astype(jnp.bfloat16),
                            preferred_element_type=jnp.float32) + b3_ref[...], 0.0)
    o_ref[...] = jnp.dot(w4_ref[...], h.astype(jnp.bfloat16),
                         preferred_element_type=jnp.float32) + b4_ref[...]


def _emb_tables():
    """Per-feature (sublane) freq/phase tables for the sinusoidal embedding."""
    k = jnp.arange(HALF_DIM, dtype=jnp.float32)
    freqs = jnp.exp(-(math.log(10000.0) / (HALF_DIM - 1)) * k)          # (8,)
    freq = jnp.concatenate([freqs, freqs]).reshape(TIME_EMB_DIM, 1)     # (16, 1)
    phase = jnp.concatenate(
        [jnp.zeros((HALF_DIM,), jnp.float32),
         jnp.full((HALF_DIM,), math.pi / 2, jnp.float32)]).reshape(TIME_EMB_DIM, 1)
    return freq, phase


def make_params(key):
    """Parameter init mirroring FNN._initialize_weights (+ default bias init),
    returned in kernel-ready feature-major layout: weights stay in PyTorch
    (out, in) orientation, fc2/fc3/fc4 weights in bf16, fc4/b4 padded to 8 rows,
    biases as (out, 1) f32 columns."""
    ks = jax.random.split(key, 8)
    concat_dim = INPUT_DIM + TIME_EMB_DIM  # 18

    w1 = jax.random.normal(ks[0], (HIDDEN, concat_dim), jnp.float32) / math.sqrt(concat_dim)
    w2 = jax.random.normal(ks[1], (HIDDEN, HIDDEN), jnp.float32) / math.sqrt(HIDDEN)
    w3 = jax.random.normal(ks[2], (HIDDEN, HIDDEN), jnp.float32) / math.sqrt(HIDDEN)
    w4 = jax.random.normal(ks[3], (INPUT_DIM, HIDDEN), jnp.float32) / math.sqrt(HIDDEN)
    b1 = jax.random.uniform(ks[4], (HIDDEN,), jnp.float32,
                            -1 / math.sqrt(concat_dim), 1 / math.sqrt(concat_dim))
    b2 = jax.random.uniform(ks[5], (HIDDEN,), jnp.float32,
                            -1 / math.sqrt(HIDDEN), 1 / math.sqrt(HIDDEN))
    b3 = jax.random.uniform(ks[6], (HIDDEN,), jnp.float32,
                            -1 / math.sqrt(HIDDEN), 1 / math.sqrt(HIDDEN))
    b4 = jax.random.uniform(ks[7], (INPUT_DIM,), jnp.float32,
                            -1 / math.sqrt(HIDDEN), 1 / math.sqrt(HIDDEN))

    # fc1 split: x-part aligned with the packed (t, x0, x1, 0...) input rows.
    w1x = jnp.zeros((HIDDEN, XT_ROWS), jnp.float32).at[:, 1:1 + INPUT_DIM].set(
        w1[:, :INPUT_DIM])                                               # (128, 8)  f32
    w1e = w1[:, INPUT_DIM:]                                              # (128, 16) f32
    w2p = w2.astype(jnp.bfloat16)                                        # (128, 128) bf16
    w3p = w3.astype(jnp.bfloat16)
    w4p = jnp.zeros((OUT_ROWS, HIDDEN), jnp.bfloat16).at[:INPUT_DIM, :].set(
        w4.astype(jnp.bfloat16))                                         # (8, 128) bf16
    b1p = b1.reshape(HIDDEN, 1)
    b2p = b2.reshape(HIDDEN, 1)
    b3p = b3.reshape(HIDDEN, 1)
    b4p = jnp.zeros((OUT_ROWS, 1), jnp.float32).at[:INPUT_DIM, 0].set(b4)
    return (w1x, w1e, b1p, w2p, b2p, w3p, b3p, w4p, b4p)


def _choose_tiling(B):
    """Batch lives on the lane axis -> tiles are multiples of 128 lanes.
    Prefer >= 2 grid steps (v7x has 2 TensorCores), tiles as large as possible
    (amortize per-step overhead), capped at TB_MAX."""
    bp0 = max(LANE_MIN, -(-B // LANE_MIN) * LANE_MIN)
    if bp0 <= LANE_MIN:
        return LANE_MIN, LANE_MIN
    tb = min(TB_MAX, max(LANE_MIN, (bp0 // 2 // LANE_MIN) * LANE_MIN))
    bp = -(-bp0 // tb) * tb
    return tb, bp


def fnn_forward(x, t, params):
    """x: (B, 2) f32, t: (B,) f32  ->  (B, 2) f32"""
    B = x.shape[0]
    tb, bp = _choose_tiling(B)

    # Single packed feature-major input block: row 0 = t, rows 1-2 = x.T, rest 0.
    xt = jnp.zeros((XT_ROWS, bp), jnp.float32)
    xt = xt.at[0, :B].set(t).at[1:1 + INPUT_DIM, :B].set(x.T)

    freq, phase = _emb_tables()
    (w1x, w1e, b1, w2, b2, w3, b3, w4, b4) = params

    def col_spec(shape):    # tiled along the batch (lane) grid
        return pl.BlockSpec(shape, lambda i: (0, i))

    def const_spec(shape):  # resident in VMEM across all grid steps
        return pl.BlockSpec(shape, lambda i: (0, 0))

    out = pl.pallas_call(
        fnn_kernel,
        out_shape=jax.ShapeDtypeStruct((OUT_ROWS, bp), jnp.float32),
        grid=(bp // tb,),
        in_specs=[
            col_spec((XT_ROWS, tb)),              # packed [t; x] input
            const_spec((TIME_EMB_DIM, 1)),        # freq table
            const_spec((TIME_EMB_DIM, 1)),        # phase table
            const_spec((HIDDEN, XT_ROWS)),        # w1x (f32, K=8)
            const_spec((HIDDEN, TIME_EMB_DIM)),   # w1e (f32, K=16)
            const_spec((HIDDEN, 1)),              # b1
            const_spec((HIDDEN, HIDDEN)),         # w2 (bf16)
            const_spec((HIDDEN, 1)),              # b2
            const_spec((HIDDEN, HIDDEN)),         # w3 (bf16)
            const_spec((HIDDEN, 1)),              # b3
            const_spec((OUT_ROWS, HIDDEN)),       # w4 (bf16, padded rows)
            const_spec((OUT_ROWS, 1)),            # b4
        ],
        out_specs=col_spec((OUT_ROWS, tb)),       # lane-dense (8, bp) output
        compiler_params=pltpu.CompilerParams(
            dimension_semantics=("parallel",)),
    )(xt, freq, phase, w1x, w1e, b1, w2, b2, w3, b3, w4, b4)

    # Cheap: only 8 rows of f32 (32 B per batch column) instead of a 512 B/row slab.
    return out[:INPUT_DIM, :B].T


def fnn_reference(x, t, params):
    """Pure-JAX f32 reference (same bf16-rounded fc2/fc3/fc4 weights)."""
    (w1x, w1e, b1, w2, b2, w3, b3, w4, b4) = params
    k = jnp.arange(HALF_DIM, dtype=jnp.float32)
    freqs = jnp.exp(-(math.log(10000.0) / (HALF_DIM - 1)) * k)
    ang = t[:, None] * freqs[None, :]
    emb = jnp.concatenate([jnp.sin(ang), jnp.cos(ang)], axis=1)            # (B, 16)
    wx = w1x[:, 1:1 + INPUT_DIM]                                           # (128, 2)
    h = jnp.maximum(emb @ w1e.T + x @ wx.T + b1[:, 0][None, :], 0.0)
    h = jnp.maximum(h @ w2.astype(jnp.float32).T + b2[:, 0][None, :], 0.0)
    h = jnp.maximum(h @ w3.astype(jnp.float32).T + b3[:, 0][None, :], 0.0)
    out = h @ w4.astype(jnp.float32).T + b4[:, 0][None, :]
    return out[:, :INPUT_DIM]


if __name__ == "__main__":
    key = jax.random.PRNGKey(0)
    k_param, k_x, k_t = jax.random.split(key, 3)

    B = 500  # pads to bp=512, tb=256 -> 2 grid steps (both v7x cores), padded tail
    x = jax.random.normal(k_x, (B, INPUT_DIM), jnp.float32)
    t = jax.random.uniform(k_t, (B,), jnp.float32, minval=0.0, maxval=1000.0)

    params = make_params(k_param)
    fwd = jax.jit(fnn_forward)
    y = fwd(x, t, params)
    jax.block_until_ready(y)

    assert y.shape == (B, INPUT_DIM) and y.dtype == jnp.float32
    y_ref = fnn_reference(x, t, params)
    err = float(jnp.max(jnp.abs(y - y_ref)))
    assert err < 5e-2, f"max abs error {err}"
    print("KERNEL_OK")
</pallas_src>

<mosaic_0001>
module attributes {stable_mosaic.version = 11 : i64} {
  func.func @fnn_kernel(%arg0: i32, %arg1: memref<8x256xf32, #tpu.memory_space<vmem>>, %arg2: memref<16x1xf32, #tpu.memory_space<vmem>>, %arg3: memref<16x1xf32, #tpu.memory_space<vmem>>, %arg4: memref<128x8xf32, #tpu.memory_space<vmem>>, %arg5: memref<128x16xf32, #tpu.memory_space<vmem>>, %arg6: memref<128x1xf32, #tpu.memory_space<vmem>>, %arg7: memref<128x128xbf16, #tpu.memory_space<vmem>>, %arg8: memref<128x1xf32, #tpu.memory_space<vmem>>, %arg9: memref<128x128xbf16, #tpu.memory_space<vmem>>, %arg10: memref<128x1xf32, #tpu.memory_space<vmem>>, %arg11: memref<8x128xbf16, #tpu.memory_space<vmem>>, %arg12: memref<8x1xf32, #tpu.memory_space<vmem>>, %arg13: memref<8x256xf32, #tpu.memory_space<vmem>>) attributes {dimension_semantics = [#tpu.dimension_semantics<parallel>], iteration_bounds = array<i64: 2>, scalar_prefetch = 0 : i64, scratch_operands = 0 : i64, tpu.core_type = #tpu.core_type<tc>, window_params = [{transform_indices = @transform_0, window_bounds = array<i64: 8, 256>}, {pipeline_mode = #tpu.pipeline_mode<synchronous>, transform_indices = @transform_1, window_bounds = array<i64: 16, 1>}, {pipeline_mode = #tpu.pipeline_mode<synchronous>, transform_indices = @transform_2, window_bounds = array<i64: 16, 1>}, {pipeline_mode = #tpu.pipeline_mode<synchronous>, transform_indices = @transform_3, window_bounds = array<i64: 128, 8>}, {pipeline_mode = #tpu.pipeline_mode<synchronous>, transform_indices = @transform_4, window_bounds = array<i64: 128, 16>}, {pipeline_mode = #tpu.pipeline_mode<synchronous>, transform_indices = @transform_5, window_bounds = array<i64: 128, 1>}, {pipeline_mode = #tpu.pipeline_mode<synchronous>, transform_indices = @transform_6, window_bounds = array<i64: 128, 128>}, {pipeline_mode = #tpu.pipeline_mode<synchronous>, transform_indices = @transform_7, window_bounds = array<i64: 128, 1>}, {pipeline_mode = #tpu.pipeline_mode<synchronous>, transform_indices = @transform_8, window_bounds = array<i64: 128, 128>}, {pipeline_mode = #tpu.pipeline_mode<synchronous>, transform_indices = @transform_9, window_bounds = array<i64: 128, 1>}, {pipeline_mode = #tpu.pipeline_mode<synchronous>, transform_indices = @transform_10, window_bounds = array<i64: 8, 128>}, {pipeline_mode = #tpu.pipeline_mode<synchronous>, transform_indices = @transform_11, window_bounds = array<i64: 8, 1>}, {transform_indices = @transform_12, window_bounds = array<i64: 8, 256>}]} {
    %c0 = arith.constant 0 : index
    %c0_0 = arith.constant 0 : index
    %0 = vector.load %arg1[%c0, %c0_0] : memref<8x256xf32, #tpu.memory_space<vmem>>, vector<8x256xf32>
    %1 = vector.extract_strided_slice %0 {offsets = [0, 0], sizes = [1, 256], strides = [1, 1]} : vector<8x256xf32> to vector<1x256xf32>
    %c0_1 = arith.constant 0 : index
    %c0_2 = arith.constant 0 : index
    %2 = vector.load %arg2[%c0_1, %c0_2] : memref<16x1xf32, #tpu.memory_space<vmem>>, vector<16x1xf32>
    %3 = vector.broadcast %2 : vector<16x1xf32> to vector<16x256xf32>
    %4 = vector.broadcast %1 : vector<1x256xf32> to vector<16x256xf32>
    %5 = arith.mulf %3, %4 : vector<16x256xf32>
    %c0_3 = arith.constant 0 : index
    %c0_4 = arith.constant 0 : index
    %6 = vector.load %arg3[%c0_3, %c0_4] : memref<16x1xf32, #tpu.memory_space<vmem>>, vector<16x1xf32>
    %7 = vector.broadcast %6 : vector<16x1xf32> to vector<16x256xf32>
    %8 = arith.addf %5, %7 : vector<16x256xf32>
    %9 = math.sin %8 : vector<16x256xf32>
    %c0_5 = arith.constant 0 : index
    %c0_6 = arith.constant 0 : index
    %10 = vector.load %arg5[%c0_5, %c0_6] : memref<128x16xf32, #tpu.memory_space<vmem>>, vector<128x16xf32>
    %cst = arith.constant dense<0.000000e+00> : vector<128x256xf32>
    %11 = tpu.matmul %10, %9, %cst {dimension_numbers = #tpu.dot_dimension_numbers<[1], [0], [0], [1], [0, 0, 1, 1], [], []>} : vector<128x16xf32>, vector<16x256xf32>, vector<128x256xf32> -> vector<128x256xf32>
    %c0_7 = arith.constant 0 : index
    %c0_8 = arith.constant 0 : index
    %12 = vector.load %arg4[%c0_7, %c0_8] : memref<128x8xf32, #tpu.memory_space<vmem>>, vector<128x8xf32>
    %cst_9 = arith.constant dense<0.000000e+00> : vector<128x256xf32>
    %13 = tpu.matmul %12, %0, %cst_9 {dimension_numbers = #tpu.dot_dimension_numbers<[1], [0], [0], [1], [0, 0, 1, 1], [], []>} : vector<128x8xf32>, vector<8x256xf32>, vector<128x256xf32> -> vector<128x256xf32>
    %14 = arith.addf %11, %13 : vector<128x256xf32>
    %c0_10 = arith.constant 0 : index
    %c0_11 = arith.constant 0 : index
    %15 = vector.load %arg6[%c0_10, %c0_11] : memref<128x1xf32, #tpu.memory_space<vmem>>, vector<128x1xf32>
    %16 = vector.broadcast %15 : vector<128x1xf32> to vector<128x256xf32>
    %17 = arith.addf %14, %16 : vector<128x256xf32>
    %cst_12 = arith.constant 0.000000e+00 : f32
    %18 = vector.broadcast %cst_12 : f32 to vector<128x256xf32>
    %19 = arith.maximumf %17, %18 : vector<128x256xf32>
    %c0_13 = arith.constant 0 : index
    %c0_14 = arith.constant 0 : index
    %20 = vector.load %arg7[%c0_13, %c0_14] : memref<128x128xbf16, #tpu.memory_space<vmem>>, vector<128x128xbf16>
    %21 = arith.truncf %19 : vector<128x256xf32> to vector<128x256xbf16>
    %cst_15 = arith.constant dense<0.000000e+00> : vector<128x256xf32>
    %22 = tpu.matmul %20, %21, %cst_15 {dimension_numbers = #tpu.dot_dimension_numbers<[1], [0], [0], [1], [0, 0, 1, 1], [], []>} : vector<128x128xbf16>, vector<128x256xbf16>, vector<128x256xf32> -> vector<128x256xf32>
    %c0_16 = arith.constant 0 : index
    %c0_17 = arith.constant 0 : index
    %23 = vector.load %arg8[%c0_16, %c0_17] : memref<128x1xf32, #tpu.memory_space<vmem>>, vector<128x1xf32>
    %24 = vector.broadcast %23 : vector<128x1xf32> to vector<128x256xf32>
    %25 = arith.addf %22, %24 : vector<128x256xf32>
    %cst_18 = arith.constant 0.000000e+00 : f32
    %26 = vector.broadcast %cst_18 : f32 to vector<128x256xf32>
    %27 = arith.maximumf %25, %26 : vector<128x256xf32>
    %c0_19 = arith.constant 0 : index
    %c0_20 = arith.constant 0 : index
    %28 = vector.load %arg9[%c0_19, %c0_20] : memref<128x128xbf16, #tpu.memory_space<vmem>>, vector<128x128xbf16>
    %29 = arith.truncf %27 : vector<128x256xf32> to vector<128x256xbf16>
    %cst_21 = arith.constant dense<0.000000e+00> : vector<128x256xf32>
    %30 = tpu.matmul %28, %29, %cst_21 {dimension_numbers = #tpu.dot_dimension_numbers<[1], [0], [0], [1], [0, 0, 1, 1], [], []>} : vector<128x128xbf16>, vector<128x256xbf16>, vector<128x256xf32> -> vector<128x256xf32>
    %c0_22 = arith.constant 0 : index
    %c0_23 = arith.constant 0 : index
    %31 = vector.load %arg10[%c0_22, %c0_23] : memref<128x1xf32, #tpu.memory_space<vmem>>, vector<128x1xf32>
    %32 = vector.broadcast %31 : vector<128x1xf32> to vector<128x256xf32>
    %33 = arith.addf %30, %32 : vector<128x256xf32>
    %cst_24 = arith.constant 0.000000e+00 : f32
    %34 = vector.broadcast %cst_24 : f32 to vector<128x256xf32>
    %35 = arith.maximumf %33, %34 : vector<128x256xf32>
    %c0_25 = arith.constant 0 : index
    %c0_26 = arith.constant 0 : index
    %36 = vector.load %arg11[%c0_25, %c0_26] : memref<8x128xbf16, #tpu.memory_space<vmem>>, vector<8x128xbf16>
    %37 = arith.truncf %35 : vector<128x256xf32> to vector<128x256xbf16>
    %cst_27 = arith.constant dense<0.000000e+00> : vector<8x256xf32>
    %38 = tpu.matmul %36, %37, %cst_27 {dimension_numbers = #tpu.dot_dimension_numbers<[1], [0], [0], [1], [0, 0, 1, 1], [], []>} : vector<8x128xbf16>, vector<128x256xbf16>, vector<8x256xf32> -> vector<8x256xf32>
    %c0_28 = arith.constant 0 : index
    %c0_29 = arith.constant 0 : index
    %39 = vector.load %arg12[%c0_28, %c0_29] : memref<8x1xf32, #tpu.memory_space<vmem>>, vector<8x1xf32>
    %40 = vector.broadcast %39 : vector<8x1xf32> to vector<8x256xf32>
    %41 = arith.addf %38, %40 : vector<8x256xf32>
    %c0_30 = arith.constant 0 : index
    %c0_31 = arith.constant 0 : index
    %42 = vector.load %arg13[%c0_30, %c0_31] : memref<8x256xf32, #tpu.memory_space<vmem>>, vector<8x256xf32>
    tpu.vector_store %arg13[%c0_30, %c0_31], %41 {strides = array<i32>} : memref<8x256xf32, #tpu.memory_space<vmem>>, vector<8x256xf32>,
    return
  }
  func.func @transform_0(%arg0: i32) -> (i32, i32) {
    %c0_i32 = arith.constant 0 : i32
    %c0_i32_0 = arith.constant 0 : i32
    return %c0_i32, %arg0 : i32, i32
  }
  func.func @transform_1(%arg0: i32) -> (i32, i32) {
    %c0_i32 = arith.constant 0 : i32
    %c0_i32_0 = arith.constant 0 : i32
    %c0_i32_1 = arith.constant 0 : i32
    return %c0_i32, %c0_i32_0 : i32, i32
  }
  func.func @transform_2(%arg0: i32) -> (i32, i32) {
    %c0_i32 = arith.constant 0 : i32
    %c0_i32_0 = arith.constant 0 : i32
    %c0_i32_1 = arith.constant 0 : i32
    return %c0_i32, %c0_i32_0 : i32, i32
  }
  func.func @transform_3(%arg0: i32) -> (i32, i32) {
    %c0_i32 = arith.constant 0 : i32
    %c0_i32_0 = arith.constant 0 : i32
    %c0_i32_1 = arith.constant 0 : i32
    return %c0_i32, %c0_i32_0 : i32, i32
  }
  func.func @transform_4(%arg0: i32) -> (i32, i32) {
    %c0_i32 = arith.constant 0 : i32
    %c0_i32_0 = arith.constant 0 : i32
    %c0_i32_1 = arith.constant 0 : i32
    return %c0_i32, %c0_i32_0 : i32, i32
  }
  func.func @transform_5(%arg0: i32) -> (i32, i32) {
    %c0_i32 = arith.constant 0 : i32
    %c0_i32_0 = arith.constant 0 : i32
    %c0_i32_1 = arith.constant 0 : i32
    return %c0_i32, %c0_i32_0 : i32, i32
  }
  func.func @transform_6(%arg0: i32) -> (i32, i32) {
    %c0_i32 = arith.constant 0 : i32
    %c0_i32_0 = arith.constant 0 : i32
    %c0_i32_1 = arith.constant 0 : i32
    return %c0_i32, %c0_i32_0 : i32, i32
  }
  func.func @transform_7(%arg0: i32) -> (i32, i32) {
    %c0_i32 = arith.constant 0 : i32
    %c0_i32_0 = arith.constant 0 : i32
    %c0_i32_1 = arith.constant 0 : i32
    return %c0_i32, %c0_i32_0 : i32, i32
  }
  func.func @transform_8(%arg0: i32) -> (i32, i32) {
    %c0_i32 = arith.constant 0 : i32
    %c0_i32_0 = arith.constant 0 : i32
    %c0_i32_1 = arith.constant 0 : i32
    return %c0_i32, %c0_i32_0 : i32, i32
  }
  func.func @transform_9(%arg0: i32) -> (i32, i32) {
    %c0_i32 = arith.constant 0 : i32
    %c0_i32_0 = arith.constant 0 : i32
    %c0_i32_1 = arith.constant 0 : i32
    return %c0_i32, %c0_i32_0 : i32, i32
  }
  func.func @transform_10(%arg0: i32) -> (i32, i32) {
    %c0_i32 = arith.constant 0 : i32
    %c0_i32_0 = arith.constant 0 : i32
    %c0_i32_1 = arith.constant 0 : i32
    return %c0_i32, %c0_i32_0 : i32, i32
  }
  func.func @transform_11(%arg0: i32) -> (i32, i32) {
    %c0_i32 = arith.constant 0 : i32
    %c0_i32_0 = arith.constant 0 : i32
    %c0_i32_1 = arith.constant 0 : i32
    return %c0_i32, %c0_i32_0 : i32, i32
  }
  func.func @transform_12(%arg0: i32) -> (i32, i32) {
    %c0_i32 = arith.constant 0 : i32
    %c0_i32_0 = arith.constant 0 : i32
    return %c0_i32, %arg0 : i32, i32
  }
}

</mosaic_0001>

<bundles_post_ra>
// kernel: fnn_forward.1
= control target key start
LH: loop header
LB: loop body
LE: loop exit
PB: predicated region body
PF: predicated region fallthrough
CT: control target
= control target key end

     0   :  { %s2476_s21 = smov 0   ;;  %s3541_s0 = inlined_call_operand.vmem [shape: f32[8,512], index: 0, kind: input, shape index: {}]   ;;  %s3542_s1 = inlined_call_operand.vmem [shape: f32[16,1], index: 1, kind: input, shape index: {}]   ;;  %s3543_s2 = inlined_call_operand.vmem [shape: f32[16,1], index: 2, kind: input, shape index: {}]   ;;  %s3544_s3 = inlined_call_operand.vmem [shape: f32[128,8], index: 3, kind: input, shape index: {}]   ;;  %s3545_s4 = inlined_call_operand.vmem [shape: f32[128,16], index: 4, kind: input, shape index: {}]   ;;  %s3546_s5 = inlined_call_operand.vmem [shape: f32[128,1], index: 5, kind: input, shape index: {}]   ;;  %s3547_s6 = inlined_call_operand.vmem [shape: bf16[128,128], index: 6, kind: input, shape index: {}]   ;;  %s3548_s7 = inlined_call_operand.vmem [shape: f32[128,1], index: 7, kind: input, shape index: {}]   ;;  %s3549_s8 = inlined_call_operand.vmem [shape: bf16[128,128], index: 8, kind: input, shape index: {}]   ;;  %s3550_s9 = inlined_call_operand.vmem [shape: f32[128,1], index: 9, kind: input, shape index: {}]   ;;  %s3551_s10 = inlined_call_operand.vmem [shape: bf16[8,128], index: 10, kind: input, shape index: {}]   ;;  %s3552_s11 = inlined_call_operand.vmem [shape: f32[8,1], index: 11, kind: input, shape index: {}]   ;;  %s3553_s12 = inlined_call_operand.vmem [shape: f32[8,512], index: 12, kind: output, shape index: {}]  }
   0x1 LB: > { %s2252_s22 = sadd.s32 4294967295, %s2401_s21   ;;  %p2256_p0 = scmp.ge.s32.totalorder %s2401_s21, 1  ;;  %s2401_s21 = sphi %s2476_s21, %s22_s21  }
   0x2   : > { %p363_p1 = scmp.lt.s32.totalorder %s2401_s21, 3 }
   0x4   : > { %p364_p2 = pnand %p2256_p0, %p363_p1 }
   0x6   : > { %367 = sbr.rel (%p364_p2) target bundleno = 1358 (0x54e), region = 68 }
   0xb   : > { %v445_v0 = vld [vmem:[%s3543_s2 + $0x8] sm:$0xff]  ;;  %v3554_v2 = vmov 0   ;;  %s2257_s27 = sshll.u32 %s2252_s22, 1  ;;  %v444_v3 = vld [vmem:[%s3543_s2] sm:$0xff]  ;;  %v1343_v5 = vld [vmem:[%s3546_s5 + $0x78] sm:$0xff]  ;;  %v2404_v47 = vmov 0.0   ;;  %v432_v58 = vlaneseq }
   0xc   : > { %v421_v1 = vld [vmem:[%s3542_s1 + $0x8] sm:$0xff]  ;;  %2362 = vset.pattern.permute.xlu1 %v3554_v2  ;;  %2361 = vset.pattern.permute.xlu0 %v3554_v2  ;;  %v420_v4 = vld [vmem:[%s3542_s1] sm:$0xff]  ;;  %p406_p3 = scmp.lt.s32.totalorder %s2257_s27, 3  ;;  %v1342_v6 = vld [vmem:[%s3546_s5 + $0x70] sm:$0xff]  ;;  %vm908_vm0 = vcmask 64512  }
   0xd   : > { %453 = vperm.xlu1 %2362, %v445_v0   ;;  %429 = vperm.xlu0 %2361, %v421_v1   ;;  %v1341_v7 = vld [vmem:[%s3546_s5 + $0x68] sm:$0xff]  ;;  %v1340_v8 = vld [vmem:[%s3546_s5 + $0x60] sm:$0xff]  ;;  %v1339_v9 = vld [vmem:[%s3546_s5 + $0x58] sm:$0xff]  ;;  %v433_v59 = vshrl.u32 %v432_v58, 7 }
   0xe   : > { %s3591_s27 = smov (!%p406_p3, %s2257_s27), 3  ;;  %v1338_v10 = vld [vmem:[%s3546_s5 + $0x50] sm:$0xff]  ;;  %v1337_v11 = vld [vmem:[%s3546_s5 + $0x48] sm:$0xff]  ;;  %v1336_v12 = vld [vmem:[%s3546_s5 + $0x40] sm:$0xff]  ;;  %1111 = vmatprep.mubr.f32.mxu1 %v2404_v47  ;;  %1021 = vmatprep.mubr.f32.mxu0 %v2404_v47 }
   0xf   : > { %s2258_s23 = sshll.u32 %s3591_s27, 3  ;;  %v1335_v15 = vld [vmem:[%s3546_s5 + $0x38] sm:$0xff]  ;;  %v1334_v16 = vld [vmem:[%s3546_s5 + $0x30] sm:$0xff]  ;;  %v1333_v17 = vld [vmem:[%s3546_s5 + $0x28] sm:$0xff]  ;;  %v434_v60 = vsub.s32 0, %v433_v59 }
  0x10   : > { %s409_s26 = scalar_lea.vmem %s3541_s0, %s2258_s23  ;;  %v1332_v18 = vld [vmem:[%s3546_s5 + $0x20] sm:$0xff]  ;;  %v1331_v19 = vld [vmem:[%s3546_s5 + $0x18] sm:$0xff]  ;;  %v1330_v20 = vld [vmem:[%s3546_s5 + $0x10] sm:$0xff]  ;;  %s415_s20 = scalar_lea.vmem %s3553_s12, %s2258_s23 }
  0x11   : > { %448 = vperm.xlu1 %2362, %v444_v3   ;;  %424 = vperm.xlu0 %2361, %v420_v4   ;;  %v2530_v13 = vld [vmem:[%s409_s26] sm:$0xff]  ;;  %v2532_v14 = vld [vmem:[%s409_s26 + $0x8] sm:$0xff]  ;;  %v1535_v23 = vld [vmem:[%s3548_s7 + $0x78] sm:$0xff] }
  0x12   : > { %2327 = vmatprep.subr.mxu1 %v2532_v14  ;;  %987 = vmatprep.subr.mxu0 %v2532_v14  ;;  %v1329_v21 = vld [vmem:[%s3546_s5 + $0x8] sm:$0xff]  ;;  %v1328_v22 = vld [vmem:[%s3546_s5] sm:$0xff]  ;;  %v1534_v24 = vld [vmem:[%s3548_s7 + $0x70] sm:$0xff]  ;;  %v435_v61 = vrot.slane %v2530_v13, %v434_v60  ;;  %v439_v62 = vrot.slane %v2532_v14, %v434_v60 }
  0x13   : > { %2328 = vmatpush1.msra.mxu1 %v2530_v13  ;;  %988 = vmatpush1.msra.mxu0 %v2530_v13  ;;  %v1533_v25 = vld [vmem:[%s3548_s7 + $0x68] sm:$0xff]  ;;  %v1532_v26 = vld [vmem:[%s3548_s7 + $0x60] sm:$0xff]  ;;  %v1531_v27 = vld [vmem:[%s3548_s7 + $0x58] sm:$0xff] }
  0x14   : > { %v1530_v28 = vld [vmem:[%s3548_s7 + $0x50] sm:$0xff]  ;;  %v1529_v29 = vld [vmem:[%s3548_s7 + $0x48] sm:$0xff]  ;;  %v1528_v30 = vld [vmem:[%s3548_s7 + $0x40] sm:$0xff] }
  0x15   : > { %1421 = vperm.xlu1 %2362, %v1343_v5   ;;  %1416 = vperm.xlu0 %2361, %v1342_v6   ;;  %v1527_v31 = vld [vmem:[%s3548_s7 + $0x38] sm:$0xff]  ;;  %v1526_v32 = vld [vmem:[%s3548_s7 + $0x30] sm:$0xff]  ;;  %v1525_v33 = vld [vmem:[%s3548_s7 + $0x28] sm:$0xff] }
  0x16   : > { %v1524_v34 = vld [vmem:[%s3548_s7 + $0x20] sm:$0xff]  ;;  %v1523_v35 = vld [vmem:[%s3548_s7 + $0x18] sm:$0xff]  ;;  %v1522_v36 = vld [vmem:[%s3548_s7 + $0x10] sm:$0xff] }
  0x17   : > { %v1521_v37 = vld [vmem:[%s3548_s7 + $0x8] sm:$0xff]  ;;  %v1520_v38 = vld [vmem:[%s3548_s7] sm:$0xff]  ;;  %v1856_v39 = vld [vmem:[%s3550_s9 + $0x78] sm:$0xff] }
  0x18   : > { %v1855_v40 = vld [vmem:[%s3550_s9 + $0x70] sm:$0xff]  ;;  %v1854_v41 = vld [vmem:[%s3550_s9 + $0x68] sm:$0xff]  ;;  %v1853_v42 = vld [vmem:[%s3550_s9 + $0x60] sm:$0xff] }
  0x19   : > { %1411 = vperm.xlu1 %2362, %v1341_v7   ;;  %1406 = vperm.xlu0 %2361, %v1340_v8   ;;  %v1852_v43 = vld [vmem:[%s3550_s9 + $0x58] sm:$0xff]  ;;  %v1851_v44 = vld [vmem:[%s3550_s9 + $0x50] sm:$0xff]  ;;  %v1850_v45 = vld [vmem:[%s3550_s9 + $0x48] sm:$0xff] }
  0x1a   : > { %v1849_v46 = vld [vmem:[%s3550_s9 + $0x40] sm:$0xff]  ;;  %v907_v48 = vld [vmem:[%s3544_s3 + $0x78] sm:$0xff]  ;;  %v1847_v50 = vld [vmem:[%s3550_s9 + $0x30] sm:$0xff] }
  0x1b   : > { %v1848_v49 = vld [vmem:[%s3550_s9 + $0x38] sm:$0xff]  ;;  %2292 = vmatmul.mubr.msk.f32.vlgmr.msra.gmra.mxu1 %vm908_vm0, %v907_v48  ;;  %v1846_v51 = vld [vmem:[%s3550_s9 + $0x28] sm:$0xff]  ;;  %v1845_v52 = vld [vmem:[%s3550_s9 + $0x20] sm:$0xff] }
  0x1c   : > { %1231 = vmatprep.mubr.f32.mxu1 %v2404_v47  ;;  %v1844_v53 = vld [vmem:[%s3550_s9 + $0x18] sm:$0xff]  ;;  %v1843_v54 = vld [vmem:[%s3550_s9 + $0x10] sm:$0xff]  ;;  %v1842_v55 = vld [vmem:[%s3550_s9 + $0x8] sm:$0xff] }
  0x1d   : > { %1401 = vperm.xlu1 %2362, %v1339_v9   ;;  %1396 = vperm.xlu0 %2361, %v1338_v10   ;;  %v1841_v56 = vld [vmem:[%s3550_s9] sm:$0xff] }
  0x1e   : > { %v2147_v57 = vld [vmem:[%s3552_s11] sm:$0xff] }
  0x21   : > { %1391 = vperm.xlu1 %2362, %v1337_v11   ;;  %1386 = vperm.xlu0 %2361, %v1336_v12  }
  0x25   : > { %1381 = vperm.xlu1 %2362, %v1335_v15   ;;  %1376 = vperm.xlu0 %2361, %v1334_v16  }
  0x29   : > { %1371 = vperm.xlu1 %2362, %v1333_v17   ;;  %1366 = vperm.xlu0 %2361, %v1332_v18  }
  0x2d   : > { %1361 = vperm.xlu1 %2362, %v1331_v19   ;;  %1356 = vperm.xlu0 %2361, %v1330_v20  }
  0x31   : > { %1351 = vperm.xlu1 %2362, %v1329_v21   ;;  %1346 = vperm.xlu0 %2361, %v1328_v22  }
  0x35   : > { %1613 = vperm.xlu1 %2362, %v1535_v23   ;;  %1608 = vperm.xlu0 %2361, %v1534_v24  }
  0x39   : > { %1603 = vperm.xlu1 %2362, %v1533_v25   ;;  %1598 = vperm.xlu0 %2361, %v1532_v26  }
  0x3d   : > { %1593 = vperm.xlu1 %2362, %v1531_v27   ;;  %1588 = vperm.xlu0 %2361, %v1530_v28  }
  0x41   : > { %1583 = vperm.xlu1 %2362, %v1529_v29   ;;  %1578 = vperm.xlu0 %2361, %v1528_v30  }
  0x45   : > { %1573 = vperm.xlu1 %2362, %v1527_v31   ;;  %1568 = vperm.xlu0 %2361, %v1526_v32  }
  0x49   : > { %1563 = vperm.xlu1 %2362, %v1525_v33   ;;  %1558 = vperm.xlu0 %2361, %v1524_v34  }
  0x4d   : > { %1553 = vperm.xlu1 %2362, %v1523_v35   ;;  %1548 = vperm.xlu0 %2361, %v1522_v36  }
  0x51   : > { %1543 = vperm.xlu1 %2362, %v1521_v37   ;;  %1538 = vperm.xlu0 %2361, %v1520_v38   ;;  %v892_v38 = vld [vmem:[%s3544_s3] sm:$0xff] }
  0x52   : > { %2277 = vmatmul.mubr.msk.f32.vlgmr.msra.gmra.mxu0 %vm908_vm0, %v892_v38  ;;  %v896_v38 = vld [vmem:[%s3544_s3 + $0x20] sm:$0xff] }
  0x53   : > { %1027 = vmatprep.mubr.f32.mxu0 %v2404_v47 }
  0x55   : > { %1934 = vperm.xlu1 %2362, %v1856_v39   ;;  %1929 = vperm.xlu0 %2361, %v1855_v40   ;;  %v2405_v40 = vmov 920167782  }
  0x59   : > { %1924 = vperm.xlu1 %2362, %v1854_v41   ;;  %1919 = vperm.xlu0 %2361, %v1853_v42   ;;  %v893_v42 = vld [vmem:[%s3544_s3 + $0x8] sm:$0xff] }
  0x5a   : > { %2278 = vmatmul.mubr.msk.f32.gmra.mxu0 %vm908_vm0, %v893_v42 }
  0x5b   : > { %1033 = vmatprep.mubr.f32.mxu0 %v2404_v47 }
  0x5d   : > { %1914 = vperm.xlu1 %2362, %v1852_v43   ;;  %1909 = vperm.xlu0 %2361, %v1851_v44   ;;  %v2406_v43 = vmov 2475754826  }
  0x61   : > { %1904 = vperm.xlu1 %2362, %v1850_v45   ;;  %1899 = vperm.xlu0 %2361, %v1849_v46  }
  0x65   : > { %1894 = vperm.xlu1 %2362, %v1848_v49   ;;  %1889 = vperm.xlu0 %2361, %v1847_v50   ;;  %v2407_v49 = vmov 2102212464  }
  0x69   : > { %1884 = vperm.xlu1 %2362, %v1846_v51   ;;  %1879 = vperm.xlu0 %2361, %v1845_v52   ;;  %v2408_v51 = vmov 683565275  }
  0x6d   : > { %1874 = vperm.xlu1 %2362, %v1844_v53   ;;  %1869 = vperm.xlu0 %2361, %v1843_v54   ;;  %v2409_v54 = vmov 1326507024  }
  0x71   : > { %1864 = vperm.xlu1 %2362, %v1842_v55   ;;  %1859 = vperm.xlu0 %2361, %v1841_v56  }
  0x75   : > { %2150 = vperm.xlu0 %2361, %v2147_v57  }
  0x88   : > { %v454_v63 = vpop.permute.xlu1 %453  ;;  %v430_v0 = vpop.permute.xlu0 %429 }
  0x89   : > { %v442_v1 = vmul.f32 %v435_v61, %v430_v0  ;;  %v443_v3 = vmul.f32 %v439_v62, %v430_v0  ;;  %v894_v0 = vld [vmem:[%s3544_s3 + $0x10] sm:$0xff] }
  0x8a   : > { %2279 = vmatmul.mubr.msk.f32.gmra.mxu0 %vm908_vm0, %v894_v0 }
  0x8b   : > { %v2670_v4 = vadd.f32 %v454_v63, %v442_v1  ;;  %v2672_v5 = vadd.f32 %v454_v63, %v443_v3  ;;  %1039 = vmatprep.mubr.f32.mxu0 %v2404_v47 }
  0x8c   : > { %v425_v6 = vpop.permute.xlu0 %424  ;;  %v449_v11 = vpop.permute.xlu1 %448 }
  0x8d   : > { %v671_v7 = vand.u32 2139095040, %v2670_v4  ;;  %v775_v8 = vand.u32 2139095040, %v2672_v5  ;;  %v440_v9 = vmul.f32 %v435_v61, %v425_v6  ;;  %v441_v10 = vmul.f32 %v439_v62, %v425_v6 }
  0x8e   : > { %v772_v19 = vand.u32 2147483647, %v2672_v5  ;;  %v668_v20 = vand.u32 2147483647, %v2670_v4  ;;  %v2410_v62 = vmov 2131351028  }
  0x8f   : > { %v672_v12 = vshrl.u32 %v671_v7, 23  ;;  %v776_v13 = vshrl.u32 %v775_v8, 23  ;;  %v2676_v15 = vadd.f32 %v449_v11, %v440_v9  ;;  %v2678_v14 = vadd.f32 %v449_v11, %v441_v10 }
  0x90   : > { %v779_v26 = vand.u32 8388607, %v772_v19  ;;  %v675_v29 = vand.u32 8388607, %v668_v20 }
  0x91   : > { %v2269_v16 = vadd.s32 4294967169, %v672_v12  ;;  %v2273_v17 = vadd.s32 4294967169, %v776_v13  ;;  %v567_v18 = vand.u32 2139095040, %v2678_v14  ;;  %v463_v23 = vand.u32 2139095040, %v2676_v15 }
  0x92   : > { %v780_v35 = vor.u32 8388608, %v779_v26  ;;  %v676_v37 = vor.u32 8388608, %v675_v29  ;;  %v564_v46 = vand.u32 2147483647, %v2678_v14 }
  0x93   : > { %v678_v21 = vadd.s32 1, %v2269_v16  ;;  %v782_v22 = vadd.s32 1, %v2273_v17  ;;  %v568_v24 = vshrl.u32 %v567_v18, 23  ;;  %v464_v32 = vshrl.u32 %v463_v23, 23 }
  0x94   : > { %v2704_v45 = vshll.u32 %v780_v35, 8  ;;  %v2712_v53 = vshll.u32 %v676_v37, 8 }
  0x95   : > { %vm679_vm1 = vcmp.gt.s32.totalorder %v678_v21, 0  ;;  %vm783_vm2 = vcmp.gt.s32.totalorder %v782_v22, 0  ;;  %v2265_v25 = vadd.s32 4294967169, %v568_v24  ;;  %v2261_v39 = vadd.s32 4294967169, %v464_v32  ;;  %v895_v24 = vld [vmem:[%s3544_s3 + $0x18] sm:$0xff] }
  0x96   : > { %v680_v27 = vsel %vm679_vm1, %v678_v21, 0  ;;  %v784_v28 = vsel %vm783_vm2, %v782_v22, 0  ;;  %2280 = vmatmul.mubr.msk.f32.gmra.mxu0 %vm908_vm0, %v895_v24 }
  0x97   : > { %v2688_v30 = vand.u32 31, %v680_v27  ;;  %v786_v31 = vand.u32 31, %v784_v28  ;;  %v574_v33 = vadd.s32 1, %v2265_v25  ;;  %v2707_v48 = vshrl.u32 %v680_v27, 5  ;;  %1045 = vmatprep.mubr.f32.mxu0 %v2404_v47 }
  0x98   : > { %v785_v56 = vshrl.u32 %v784_v28, 5  ;;  %v2716_v57 = vadd.s32 1, %v2261_v39 }
  0x99   : > { %v2691_v34 = vsub.s32 32, %v2688_v30  ;;  %v787_v36 = vsub.s32 32, %v786_v31  ;;  %vm575_vm3 = vcmp.gt.s32.totalorder %v574_v33, 0  ;;  %v694_v50 = vshll.u32 %v2407_v49, %v2688_v30 }
  0x9a   : > { %v789_v52 = vshll.u32 %v2408_v51, %v786_v31  ;;  %v2719_v58 = vsel %vm575_vm3, %v574_v33, 0  ;;  %v792_v61 = vshll.u32 %v2406_v43, %v786_v31  ;;  %v795_v1 = vshll.u32 %v2410_v62, %v786_v31  ;;  %2281 = vmatmul.mubr.msk.f32.gmra.mxu0 %vm908_vm0, %v896_v38  ;;  %v899_v38 = vld [vmem:[%s3544_s3 + $0x38] sm:$0xff] }
  0x9b   : > { %v695_v41 = vshrl.u32 %v2405_v40, %v2691_v34  ;;  %v790_v44 = vshrl.u32 %v2406_v43, %v787_v36  ;;  %v698_v55 = vshrl.u32 %v2409_v54, %v2691_v34  ;;  %v793_v63 = vshrl.u32 %v2410_v62, %v787_v36  ;;  %1051 = vmatprep.mubr.f32.mxu0 %v2404_v47 }
  0x9c   : > { %v796_v3 = vshrl.u32 %v2407_v49, %v787_v36  ;;  %v798_v6 = vshll.u32 %v2407_v49, %v786_v31  ;;  %v799_v7 = vshrl.u32 %v2405_v40, %v787_v36  ;;  %v697_v8 = vshll.u32 %v2405_v40, %v2688_v30 }
  0x9d   : > { %v2722_v59 = vor.u32 %v695_v41, %v694_v50  ;;  %v791_v60 = vor.u32 %v790_v44, %v789_v52  ;;  %vm703_vm4 = vcmp.lt.s32.totalorder %v2707_v48, 4  ;;  %v2738_v9 = vand.u32 31, %v2719_v58 }
  0x9e   : > { %v794_v10 = vor.u32 %v793_v63, %v792_v61  ;;  %v797_v11 = vor.u32 %v796_v3, %v795_v1  ;;  %v800_v12 = vor.u32 %v799_v7, %v798_v6  ;;  %v801_v13 = vshll.u32 %v2405_v40, %v786_v31 }
  0x9f   : > { %v802_v16 = vshrl.u32 %v2409_v54, %v787_v36  ;;  %v699_v17 = vor.u32 %v698_v55, %v697_v8  ;;  %v709_v18 = vsel %vm703_vm4, %v2722_v59, 920167782  ;;  %v788_v21 = vshrl.u32 %v2408_v51, %v787_v36 }
  0xa0   : > { %vm804_vm5 = vcmp.lt.s32.totalorder %v785_v56, 1  ;;  %vm806_vm6 = vcmp.lt.s32.totalorder %v785_v56, 3  ;;  %vm807_vm7 = vcmp.lt.s32.totalorder %v785_v56, 4  ;;  %vm805_vm8 = vcmp.lt.s32.totalorder %v785_v56, 2 }
  0xa1   : > { %v803_v22 = vor.u32 %v802_v16, %v801_v13  ;;  %v812_v23 = vsel %vm804_vm5, %v791_v60, %v794_v10  ;;  %v808_v25 = vsel %vm804_vm5, %v788_v21, %v791_v60  ;;  %v809_v26 = vsel %vm807_vm7, %v797_v11, 2102212464 }
  0xa2   : > { %v813_v27 = vsel %vm807_vm7, %v800_v12, 920167782  ;;  %v816_v28 = vsel %vm804_vm5, %v794_v10, %v797_v11  ;;  %v810_v29 = vsel %vm806_vm6, %v794_v10, %v809_v26  ;;  %vm471_vm9 = vcmp.gt.s32.totalorder %v2716_v57, 0 }
  0xa3   : > { %v814_v31 = vsel %vm806_vm6, %v797_v11, %v813_v27  ;;  %v817_v32 = vsel %vm807_vm7, %v803_v22, 1326507024  ;;  %v685_v36 = vshll.u32 %v2408_v51, %v2688_v30  ;;  %v686_v37 = vshrl.u32 %v2406_v43, %v2691_v34 }
  0xa4   : > { %v815_v33 = vsel %vm805_vm8, %v812_v23, %v814_v31  ;;  %v818_v35 = vsel %vm806_vm6, %v800_v12, %v817_v32  ;;  %v811_v39 = vsel %vm805_vm8, %v808_v25, %v810_v29  ;;  %v713_v50 = vsel %vm703_vm4, %v699_v17, 1326507024 }
  0xa5   : > { %v819_v41 = vsel %vm805_vm8, %v816_v28, %v818_v35  ;;  %v2762_v42 = vmul.u32.u64.low %v2704_v45, %v815_v33  ;;  %v2763_v44 = vmul.u32.u64.high %v2704_v45, %v815_v33, %v2762_v42  ;;  %v687_v56 = vor.u32 %v686_v37, %v685_v36 }
  0xa6   : > { %v2769_v52 = vmul.u32.u64.low %v2704_v45, %v819_v41  ;;  %v2770_v55 = vmul.u32.u64.high %v2704_v45, %v819_v41, %v2769_v52  ;;  %v688_v60 = vshll.u32 %v2406_v43, %v2688_v30  ;;  %v689_v61 = vshrl.u32 %v2410_v62, %v2691_v34 }
  0xa7   : > { %v691_v63 = vshll.u32 %v2410_v62, %v2688_v30  ;;  %v692_v0 = vshrl.u32 %v2407_v49, %v2691_v34  ;;  %v2782_v1 = vsub.s32 32, %v2738_v9  ;;  %v827_v3 = vmul.u32 %v2704_v45, %v811_v39  ;;  %v897_v30 = vld [vmem:[%s3544_s3 + $0x28] sm:$0xff] }
  0xa8   : > { %v684_v6 = vshrl.u32 %v2408_v51, %v2691_v34  ;;  %vm700_vm10 = vcmp.lt.s32.totalorder %v2707_v48, 1  ;;  %v830_v7 = vadd.s32 1, %v2763_v44  ;;  %v690_v8 = vor.u32 %v689_v61, %v688_v60  ;;  %2282 = vmatmul.mubr.msk.f32.gmra.mxu0 %vm908_vm0, %v897_v30 }
  0xa9   : > { %v693_v10 = vor.u32 %v692_v0, %v691_v63  ;;  %vm702_vm11 = vcmp.lt.s32.totalorder %v2707_v48, 3  ;;  %vm829_vm12 = vc.u32 %v2770_v55, %v2762_v42  ;;  %vm701_vm13 = vcmp.lt.s32.totalorder %v2707_v48, 2  ;;  %1057 = vmatprep.mubr.f32.mxu0 %v2404_v47 }
  0xaa   : > { %v704_v34 = vsel %vm700_vm10, %v684_v6, %v687_v56  ;;  %v714_v45 = vsel %vm702_vm11, %v2722_v59, %v713_v50  ;;  %v831_v11 = vsel %vm829_vm12, %v830_v7, %v2763_v44  ;;  %v708_v13 = vsel %vm700_vm10, %v687_v56, %v690_v8  ;;  %v898_v59 = vld [vmem:[%s3544_s3 + $0x30] sm:$0xff] }
  0xab   : > { %v705_v12 = vsel %vm703_vm4, %v693_v10, 2102212464  ;;  %v710_v16 = vsel %vm702_vm11, %v693_v10, %v709_v18  ;;  %v832_v17 = vadd.s32 %v831_v11, %v827_v3  ;;  %v712_v23 = vsel %vm700_vm10, %v690_v8, %v693_v10 }
  0xac   : > { %v706_v21 = vsel %vm702_vm11, %v690_v8, %v705_v12  ;;  %v711_v22 = vsel %vm701_vm13, %v708_v13, %v710_v16  ;;  %v715_v24 = vsel %vm701_vm13, %v712_v23, %v714_v45  ;;  %v571_v26 = vand.u32 8388607, %v564_v46  ;;  %2283 = vmatmul.mubr.msk.f32.gmra.mxu0 %vm908_vm0, %v898_v59  ;;  %v900_v8 = vld [vmem:[%s3544_s3 + $0x40] sm:$0xff] }
  0xad   : > { %v2817_v18 = vmul.u32.u64.low %v2712_v53, %v711_v22  ;;  %v2818_v25 = vmul.u32.u64.high %v2712_v53, %v711_v22, %v2817_v18  ;;  %v833_v27 = vadd.s32 536870912, %v832_v17  ;;  %v707_v28 = vsel %vm701_vm13, %v704_v34, %v706_v21  ;;  %1063 = vmatprep.mubr.f32.mxu0 %v2404_v47 }
  0xae   : > { %v2826_v29 = vmul.u32.u64.low %v2712_v53, %v715_v24  ;;  %v2827_v31 = vmul.u32.u64.high %v2712_v53, %v715_v24, %v2826_v29  ;;  %v2832_v32 = vsel %vm471_vm9, %v2716_v57, 0  ;;  %v2835_v33 = vshrl.u32 %v2719_v58, 5 }
  0xaf   : > { %v581_v35 = vshll.u32 %v2408_v51, %v2738_v9  ;;  %v582_v36 = vshrl.u32 %v2406_v43, %v2782_v1  ;;  %v2842_v48 = vshrl.u32 %v833_v27, 30  ;;  %v585_v37 = vshrl.u32 %v2410_v62, %v2782_v1 }
  0xb0   : > { %v588_v57 = vshrl.u32 %v2407_v49, %v2782_v1  ;;  %v591_v58 = vshrl.u32 %v2405_v40, %v2782_v1  ;;  %v723_v39 = vmul.u32 %v2712_v53, %v707_v28  ;;  %v726_v41 = vadd.s32 1, %v2818_v25  ;;  %2284 = vmatmul.mubr.msk.f32.gmra.mxu0 %vm908_vm0, %v899_v38 }
  0xb1   : > { %v590_v44 = vshll.u32 %v2407_v49, %v2738_v9  ;;  %v594_v50 = vshrl.u32 %v2409_v54, %v2782_v1  ;;  %v835_v52 = vshll.u32 %v2842_v48, 30  ;;  %vm725_vm14 = vc.u32 %v2827_v31, %v2817_v18  ;;  %1069 = vmatprep.mubr.f32.mxu0 %v2404_v47 }
  0xb2   : > { %v584_v56 = vshll.u32 %v2406_v43, %v2738_v9  ;;  %v587_v60 = vshll.u32 %v2410_v62, %v2738_v9  ;;  %v727_v53 = vsel %vm725_vm14, %v726_v41, %v2818_v25  ;;  %v583_v61 = vor.u32 %v582_v36, %v581_v35  ;;  %v902_v41 = vld [vmem:[%s3544_s3 + $0x50] sm:$0xff] }
  0xb3   : > { %v592_v63 = vor.u32 %v591_v58, %v590_v44  ;;  %v593_v0 = vshll.u32 %v2405_v40, %v2738_v9  ;;  %v2871_v3 = vsub.s32 %v832_v17, %v835_v52  ;;  %v728_v6 = vadd.s32 %v727_v53, %v723_v39 }
  0xb4   : > { %v586_v30 = vor.u32 %v585_v37, %v584_v56  ;;  %v589_v7 = vor.u32 %v588_v57, %v587_v60  ;;  %v2878_v10 = vand.u32 31, %v2832_v32  ;;  %v572_v11 = vor.u32 8388608, %v571_v26  ;;  %2285 = vmatmul.mubr.msk.f32.gmra.mxu0 %vm908_vm0, %v900_v8  ;;  %v903_v8 = vld [vmem:[%s3544_s3 + $0x58] sm:$0xff] }
  0xb5   : > { %v595_v34 = vor.u32 %v594_v50, %v593_v0  ;;  %v838_v45 = vsub.s32 0, %v2871_v3  ;;  %v729_v9 = vadd.s32 536870912, %v728_v6  ;;  %vm599_vm15 = vcmp.lt.s32.totalorder %v2835_v33, 4  ;;  %1075 = vmatprep.mubr.f32.mxu0 %v2404_v47 }
  0xb6   : > { %v580_v12 = vshrl.u32 %v2408_v51, %v2782_v1  ;;  %vm596_vm1 = vcmp.lt.s32.totalorder %v2835_v33, 1  ;;  %vm598_vm2 = vcmp.lt.s32.totalorder %v2835_v33, 3  ;;  %v605_v13 = vsel %vm599_vm15, %v592_v63, 920167782  ;;  %v901_v1 = vld [vmem:[%s3544_s3 + $0x48] sm:$0xff] }
  0xb7   : > { %v2274_v16 = vmin.u32 %v838_v45, %v2871_v3  ;;  %v2888_v17 = vshrl.u32 %v729_v9, 30  ;;  %v601_v21 = vsel %vm599_vm15, %v589_v7, 2102212464  ;;  %v604_v22 = vsel %vm596_vm1, %v583_v61, %v586_v30 }
  0xb8   : > { %v2897_v23 = vsub.s32 32, %v2878_v10  ;;  %v606_v59 = vsel %vm598_vm2, %v589_v7, %v605_v13  ;;  %v608_v24 = vsel %vm596_vm1, %v586_v30, %v589_v7  ;;  %v609_v25 = vsel %vm599_vm15, %v595_v34, 1326507024  ;;  %2286 = vmatmul.mubr.msk.f32.gmra.mxu0 %vm908_vm0, %v901_v1 }
  0xb9   : > { %v840_v26 = vclz %v2274_v16  ;;  %vm597_vm3 = vcmp.lt.s32.totalorder %v2835_v33, 2  ;;  %v600_v27 = vsel %vm596_vm1, %v580_v12, %v583_v61  ;;  %v612_v28 = vshll.u32 %v572_v11, 8  ;;  %1081 = vmatprep.mubr.f32.mxu0 %v2404_v47 }
  0xba   : > { %v731_v29 = vshll.u32 %v2888_v17, 30  ;;  %v602_v35 = vsel %vm598_vm2, %v586_v30, %v601_v21  ;;  %v607_v36 = vsel %vm597_vm3, %v604_v22, %v606_v59  ;;  %v610_v37 = vsel %vm598_vm2, %v592_v63, %v609_v25 }
  0xbb   : > { %v2275_v57 = vadd.s32 4294967294, %v840_v26  ;;  %v611_v58 = vsel %vm597_vm3, %v608_v24, %v610_v37  ;;  %v2916_v38 = vmul.u32.u64.low %v612_v28, %v607_v36  ;;  %v2917_v39 = vmul.u32.u64.high %v612_v28, %v607_v36, %v2916_v38 }
  0xbc   : > { %v487_v44 = vshrl.u32 %v2405_v40, %v2897_v23  ;;  %v2926_v50 = vsub.s32 %v728_v6, %v731_v29  ;;  %v2928_v52 = vmul.u32.u64.low %v612_v28, %v611_v58  ;;  %v2929_v56 = vmul.u32.u64.high %v612_v28, %v611_v58, %v2928_v52  ;;  %2287 = vmatmul.mubr.msk.f32.gmra.mxu0 %vm908_vm0, %v902_v41 }
  0xbd   : > { %v2932_v60 = vshrl.u32 %v2832_v32, 5  ;;  %vm2276_vm4 = vcmp.lt.s32.totalorder %v2275_v57, 0  ;;  %v603_v53 = vsel %vm597_vm3, %v600_v27, %v602_v35  ;;  %v486_v61 = vshll.u32 %v2407_v49, %v2878_v10  ;;  %1087 = vmatprep.mubr.f32.mxu0 %v2404_v47 }
  0xbe   : > { %v2940_v63 = vshrl.u32 %v2409_v54, %v2897_v23  ;;  %v843_v0 = vsel %vm2276_vm4, 0, %v2275_v57  ;;  %v734_v6 = vsub.s32 0, %v2926_v50  ;;  %v828_v32 = vadd.s32 %v2762_v42, %v2770_v55 }
  0xbf   : > { %v844_v30 = vsub.s32 32, %v843_v0  ;;  %v848_v7 = vsub.s32 4294967266, %v843_v0  ;;  %v622_v33 = vadd.s32 1, %v2917_v39  ;;  %v2951_v54 = vor.u32 %v487_v44, %v486_v61 }
  0xc0   : > { %v2270_v34 = vmin.u32 %v734_v6, %v2926_v50  ;;  %v619_v45 = vmul.u32 %v612_v28, %v603_v53  ;;  %vm621_vm5 = vc.u32 %v2929_v56, %v2916_v38  ;;  %v845_v42 = vshll.u32 %v2871_v3, %v843_v0  ;;  %2288 = vmatmul.mubr.msk.f32.gmra.mxu0 %vm908_vm0, %v903_v8  ;;  %v904_v3 = vld [vmem:[%s3544_s3 + $0x60] sm:$0xff] }
  0xc1   : > { %v846_v55 = vshrl.u32 %v828_v32, %v844_v30  ;;  %v849_v9 = vadd.s32 127, %v848_v7  ;;  %v623_v11 = vsel %vm621_vm5, %v622_v33, %v2917_v39  ;;  %v858_v12 = vsub.s32 4, %v2842_v48  ;;  %1093 = vmatprep.mubr.f32.mxu0 %v2404_v47 }
  0xc2   : > { %v736_v13 = vclz %v2270_v34  ;;  %v489_v16 = vshll.u32 %v2405_v40, %v2878_v10  ;;  %v624_v1 = vadd.s32 %v623_v11, %v619_v45  ;;  %vm495_vm6 = vcmp.lt.s32.totalorder %v2932_v60, 4 }
  0xc3   : > { %v847_v21 = vor.u32 %v846_v55, %v845_v42  ;;  %v850_v22 = vshll.u32 %v849_v9, 23  ;;  %vm774_vm7 = vcmp.lt.s32.totalorder %v2672_v5, 0  ;;  %v2972_v40 = vsel %vm495_vm6, %v2951_v54, 920167782 }
  0xc4   : > { %v2271_v59 = vadd.s32 4294967294, %v736_v13  ;;  %v491_v24 = vor.u32 %v2940_v63, %v489_v16  ;;  %vm2976_vm8 = vcmp.le.f32.partialorder %v772_v19, 0.7853982  ;;  %v625_v27 = vadd.s32 536870912, %v624_v1  ;;  %2289 = vmatmul.mubr.msk.f32.gmra.mxu0 %vm908_vm0, %v904_v3 }
  0xc5   : > { %v851_v26 = vor.u32 4788187, %v850_v22  ;;  %v2983_v28 = vsel %vm774_vm7, %v858_v12, %v2842_v48  ;;  %v724_v29 = vadd.s32 %v2817_v18, %v2827_v31  ;;  %v460_v35 = vand.u32 2147483647, %v2676_v15  ;;  %1099 = vmatprep.mubr.f32.mxu0 %v2404_v47  ;;  %v905_v48 = vld [vmem:[%s3544_s3 + $0x68] sm:$0xff] }
  0xc6   : > { %vm2272_vm9 = vcmp.lt.s32.totalorder %v2271_v59, 0  ;;  %v854_v19 = vcvt.s32.f32 %v847_v21  ;;  %v2989_v57 = vshrl.u32 %v625_v27, 30  ;;  %v478_v18 = vshrl.u32 %v2406_v43, %v2897_v23 }
  0xc7   : > { %v852_v36 = vand.u32 2147483647, %v851_v26  ;;  %v739_v37 = vsel %vm2272_vm9, 0, %v2271_v59  ;;  %v481_v31 = vshrl.u32 %v2410_v62, %v2897_v23  ;;  %v477_v52 = vshll.u32 %v2408_v51, %v2878_v10 }
  0xc8   : > { %v740_v58 = vsub.s32 32, %v739_v37  ;;  %v744_v39 = vsub.s32 4294967266, %v739_v37  ;;  %v627_v44 = vshll.u32 %v2989_v57, 30  ;;  %v484_v53 = vshrl.u32 %v2407_v49, %v2897_v23  ;;  %2290 = vmatmul.mubr.msk.f32.gmra.mxu0 %vm908_vm0, %v905_v48  ;;  %v906_v49 = vld [vmem:[%s3544_s3 + $0x70] sm:$0xff] }
  0xc9   : > { %v855_v41 = vmul.f32 %v854_v19, %v852_v36  ;;  %v741_v61 = vshll.u32 %v2926_v50, %v739_v37  ;;  %v480_v6 = vshll.u32 %v2406_v43, %v2878_v10  ;;  %v467_v7 = vand.u32 8388607, %v460_v35  ;;  %1105 = vmatprep.mubr.f32.mxu0 %v2404_v47 }
  0xca   : > { %v742_v63 = vshrl.u32 %v724_v29, %v740_v58  ;;  %v745_v0 = vadd.s32 127, %v744_v39  ;;  %v3008_v30 = vsub.s32 %v624_v1, %v627_v44  ;;  %v483_v33 = vshll.u32 %v2410_v62, %v2878_v10 }
  0xcb   : > { %v856_v32 = vxor.u32 2147483648, %v855_v41  ;;  %v479_v43 = vor.u32 %v478_v18, %v477_v52  ;;  %v482_v34 = vor.u32 %v481_v31, %v480_v6  ;;  %v505_v45 = vsel %vm495_vm6, %v491_v24, 1326507024 }
  0xcc   : > { %v743_v50 = vor.u32 %v742_v63, %v741_v61  ;;  %v746_v8 = vshll.u32 %v745_v0, 23  ;;  %vm670_vm10 = vcmp.lt.s32.totalorder %v2670_v4, 0  ;;  %v630_v62 = vsub.s32 0, %v3008_v30  ;;  %2291 = vmatmul.mubr.msk.f32.gmra.mxu0 %vm908_vm0, %v906_v49 }
  0xcd   : > { %v857_v42 = vsel %vm774_vm7, %v856_v32, %v855_v41  ;;  %v485_v10 = vor.u32 %v484_v53, %v483_v33  ;;  %v861_v9 = vsel %vm2976_vm8, 0, %v2983_v28  ;;  %vm3032_vm11 = vcmp.le.f32.partialorder %v668_v20, 0.7853982  ;;  %1696 = vmatprep.mubr.bf16.mxu0 %v3554_v2 }
  0xce   : > { %v860_v55 = vsel %vm2976_vm8, %v2672_v5, %v857_v42  ;;  %v747_v12 = vor.u32 4788187, %v746_v8  ;;  %v476_v13 = vshrl.u32 %v2408_v51, %v2897_v23  ;;  %v2266_v16 = vmin.u32 %v630_v62, %v3008_v30 }
  0xcf   : > { %2379 = vcosq.f32 %v860_v55  ;;  %v468_v21 = vor.u32 8388608, %v467_v7  ;;  %vm492_vm12 = vcmp.lt.s32.totalorder %v2932_v60, 1  ;;  %v750_v20 = vcvt.s32.f32 %v743_v50 }
  0xd0   : > { %2381 = vsinq.f32 %v860_v55  ;;  %v748_v22 = vand.u32 2147483647, %v747_v12  ;;  %v500_v1 = vsel %vm492_vm12, %v479_v43, %v482_v34  ;;  %v632_v3 = vclz %v2266_v16 }
  0xd1   : > { %vm493_vm13 = vcmp.lt.s32.totalorder %v2932_v60, 2  ;;  %vm494_vm14 = vcmp.lt.s32.totalorder %v2932_v60, 3  ;;  %v497_v51 = vsel %vm495_vm6, %v485_v10, 2102212464  ;;  %v504_v24 = vsel %vm492_vm12, %v482_v34, %v485_v10 }
  0xd2   : > { %v751_v23 = vmul.f32 %v750_v20, %v748_v22  ;;  %v502_v59 = vsel %vm494_vm14, %v485_v10, %v2972_v40  ;;  %v506_v25 = vsel %vm494_vm14, %v2951_v54, %v505_v45  ;;  %v2267_v26 = vadd.s32 4294967294, %v632_v3 }
  0xd3   : > { %v503_v27 = vsel %vm493_vm13, %v500_v1, %v502_v59  ;;  %v507_v28 = vsel %vm493_vm13, %v504_v24, %v506_v25  ;;  %v508_v29 = vshll.u32 %v468_v21, 8  ;;  %v865_v36 = vadd.s32 3, %v861_v9  ;;  %v882_v59 = vld [vmem:[%s3545_s4 + $0x30] sm:$0xff] }
  0xd4   : > { %v752_v19 = vxor.u32 2147483648, %v751_v23  ;;  %v754_v37 = vsub.s32 4, %v2888_v17  ;;  %v496_v40 = vsel %vm492_vm12, %v476_v13, %v479_v43  ;;  %vm2268_vm0 = vcmp.lt.s32.totalorder %v2267_v26, 0 }
  0xd5   : > { %v498_v48 = vsel %vm494_vm14, %v482_v34, %v497_v51  ;;  %v3059_v58 = vmul.u32.u64.low %v508_v29, %v507_v28  ;;  %v3060_v39 = vmul.u32.u64.high %v508_v29, %v507_v28, %v3059_v58  ;;  %v635_v18 = vsel %vm2268_vm0, 0, %v2267_v26 }
  0xd6   : > { %v753_v54 = vsel %vm670_vm10, %v752_v19, %v751_v23  ;;  %v3064_v31 = vmul.u32.u64.low %v508_v29, %v503_v27  ;;  %v3065_v41 = vmul.u32.u64.high %v508_v29, %v503_v27, %v3064_v31  ;;  %v620_v52 = vadd.s32 %v2916_v38, %v2929_v56 }
  0xd7   : > { %v756_v44 = vsel %vm3032_vm11, %v2670_v4, %v753_v54  ;;  %v636_v53 = vsub.s32 32, %v635_v18  ;;  %v640_v61 = vsub.s32 4294967266, %v635_v18  ;;  %v755_v63 = vsel %vm670_vm10, %v754_v37, %v2888_v17 }
  0xd8   : > { %2383 = vcosq.f32 %v756_v44  ;;  %v499_v0 = vsel %vm493_vm13, %v496_v40, %v498_v48  ;;  %v637_v6 = vshll.u32 %v3008_v30, %v635_v18  ;;  %v866_v33 = vand.u32 3, %v865_v36 }
  0xd9   : > { %2385 = vsinq.f32 %v756_v44  ;;  %v638_v32 = vshrl.u32 %v620_v52, %v636_v53  ;;  %v641_v7 = vadd.s32 127, %v640_v61  ;;  %vm517_vm15 = vc.u32 %v3060_v39, %v3064_v31 }
  0xda   : > { %v518_v38 = vadd.s32 1, %v3065_v41  ;;  %v757_v56 = vsel %vm3032_vm11, 0, %v755_v63  ;;  %v515_v50 = vmul.u32 %v508_v29, %v499_v0  ;;  %vm868_vm1 = vcmp.eq.s32.totalorder %v866_v33, 0 }
  0xdb   : > { %v639_v49 = vor.u32 %v638_v32, %v637_v6  ;;  %v642_v17 = vshll.u32 %v641_v7, 23  ;;  %vm871_vm2 = vcmp.eq.s32.totalorder %v866_v33, 2  ;;  %v761_v62 = vadd.s32 3, %v757_v56 }
  0xdc   : > { %v2380_v8 = vpop.eup %2379  ;;  %v519_v60 = vsel %vm517_vm15, %v518_v38, %v3065_v41  ;;  %vm867_vm3 = vcmp.lt.s32.totalorder %v866_v33, 2  ;;  %vm864_vm4 = vweird.f32 %v2672_v5  ;;  %vm566_vm5 = vcmp.lt.s32.totalorder %v2678_v14, 0 }
  0xdd   : > { %v2382_v43 = vpop.eup %2381  ;;  %v872_v34 = vxor.u32 2147483648, %v2380_v8  ;;  %v643_v30 = vor.u32 4788187, %v642_v17  ;;  %v520_v45 = vadd.s32 %v519_v60, %v515_v50  ;;  %v646_v9 = vcvt.s32.f32 %v639_v49 }
  0xde   : > { %v869_v42 = vxor.u32 2147483648, %v2382_v43  ;;  %v762_v20 = vand.u32 3, %v761_v62  ;;  %v650_v51 = vsub.s32 4, %v2989_v57  ;;  %vm3093_vm6 = vcmp.le.f32.partialorder %v564_v46, 0.7853982 }
  0xdf   : > { %v873_v10 = vsel %vm871_vm2, %v872_v34, %v2382_v43  ;;  %v644_v55 = vand.u32 2147483647, %v643_v30  ;;  %v521_v12 = vadd.s32 536870912, %v520_v45  ;;  %vm760_vm10 = vweird.f32 %v2670_v4 }
  0xe0   : > { %v870_v11 = vsel %vm868_vm1, %v2380_v8, %v869_v42  ;;  %vm767_vm7 = vcmp.eq.s32.totalorder %v762_v20, 2  ;;  %vm764_vm8 = vcmp.eq.s32.totalorder %v762_v20, 0  ;;  %v651_v19 = vsel %vm566_vm5, %v650_v51, %v2989_v57  ;;  %v880_v51 = vld [vmem:[%s3545_s4 + $0x20] sm:$0xff] }
  0xe1   : > { %v874_v13 = vsel %vm867_vm3, %v870_v11, %v873_v10  ;;  %v647_v16 = vmul.f32 %v646_v9, %v644_v55  ;;  %v3086_v21 = vshrl.u32 %v521_v12, 30  ;;  %vm763_vm9 = vcmp.lt.s32.totalorder %v762_v20, 2 }
  0xe2   : > { %v875_v22 = vsel %vm864_vm4, nan, %v874_v13  ;;  %v653_v58 = vsel %vm3093_vm6, 0, %v651_v19  ;;  %v516_v57 = vadd.s32 %v3064_v31, %v3060_v39  ;;  %vm656_vm0 = vweird.f32 %v2678_v14  ;;  %v891_v19 = vld [vmem:[%s3545_s4 + $0x78] sm:$0xff] }
  0xe3   : > { %1195 = vmatprep.subr.mxu1 %v875_v22  ;;  %v648_v1 = vxor.u32 2147483648, %v647_v16  ;;  %v523_v3 = vshll.u32 %v3086_v21, 30  ;;  %v657_v41 = vadd.s32 3, %v653_v58  ;;  %vm462_vm15 = vcmp.lt.s32.totalorder %v2676_v15, 0 }
  0xe4   : > { %v546_v30 = vsub.s32 4, %v3086_v21  ;;  %vm461_vm1 = vcmp.le.f32.partialorder %v460_v35, 0.7853982 }
  0xe5   : > { %v2384_v23 = vpop.eup %2383  ;;  %v649_v5 = vsel %vm566_vm5, %v648_v1, %v647_v16  ;;  %v524_v24 = vsub.s32 %v520_v45, %v523_v3  ;;  %v658_v61 = vand.u32 3, %v657_v41  ;;  %vm552_vm5 = vweird.f32 %v2676_v15  ;;  %v877_v1 = vld [vmem:[%s3545_s4 + $0x8] sm:$0xff]  ;;  %v879_v3 = vld [vmem:[%s3545_s4 + $0x18] sm:$0xff]  ;;  %v3196_v41 = vpop.permute.xlu1 %1421 }
  0xe6   : > { %v2386_v25 = vpop.eup %2385  ;;  %v768_v26 = vxor.u32 2147483648, %v2384_v23  ;;  %v652_v27 = vsel %vm3093_vm6, %v2678_v14, %v649_v5  ;;  %v547_v14 = vsel %vm462_vm15, %v546_v30, %v3086_v21  ;;  %v876_v21 = vld [vmem:[%s3545_s4] sm:$0xff]  ;;  %vm1118_vm6 = vcmask 130048   ;;  %v883_v5 = vld [vmem:[%s3545_s4 + $0x38] sm:$0xff] }
  0xe7   : > { %v765_v28 = vxor.u32 2147483648, %v2386_v25  ;;  %2387 = vcosq.f32 %v652_v27  ;;  %v526_v29 = vsub.s32 0, %v524_v24  ;;  %vm663_vm12 = vcmp.eq.s32.totalorder %v658_v61, 2 }
  0xe8   : > { %v769_v36 = vsel %vm767_vm7, %v768_v26, %v2386_v25  ;;  %2389 = vsinq.f32 %v652_v27  ;;  %vm660_vm13 = vcmp.eq.s32.totalorder %v658_v61, 0  ;;  %vm659_vm14 = vcmp.lt.s32.totalorder %v658_v61, 2  ;;  %v885_v25 = vld [vmem:[%s3545_s4 + $0x48] sm:$0xff]  ;;  %v886_v26 = vld [vmem:[%s3545_s4 + $0x50] sm:$0xff]  ;;  %v887_v27 = vld [vmem:[%s3545_s4 + $0x58] sm:$0xff] }
  0xe9   : > { %v766_v46 = vsel %vm764_vm8, %v2384_v23, %v765_v28  ;;  %v2262_v37 = vmin.u32 %v526_v29, %v524_v24  ;;  %v549_v62 = vsel %vm461_vm1, 0, %v547_v14  ;;  %v881_v23 = vld [vmem:[%s3545_s4 + $0x28] sm:$0xff]  ;;  %v888_v28 = vld [vmem:[%s3545_s4 + $0x60] sm:$0xff] }
  0xea   : > { %v770_v40 = vsel %vm763_vm9, %v766_v46, %v769_v36  ;;  %v553_v10 = vadd.s32 3, %v549_v62  ;;  %v889_v29 = vld [vmem:[%s3545_s4 + $0x68] sm:$0xff]  ;;  %v890_v36 = vld [vmem:[%s3545_s4 + $0x70] sm:$0xff] }
  0xeb   : > { %v771_v48 = vsel %vm760_vm10, nan, %v770_v40  ;;  %v528_v54 = vclz %v2262_v37 }
  0xec   : > { %1196 = vmatpush1.msra.mxu1 %v771_v48  ;;  %v554_v55 = vand.u32 3, %v553_v10 }
  0xed   : > { %v2263_v18 = vadd.s32 4294967294, %v528_v54 }
  0xee   : > { %vm559_vm2 = vcmp.eq.s32.totalorder %v554_v55, 2  ;;  %vm556_vm3 = vcmp.eq.s32.totalorder %v554_v55, 0  ;;  %vm555_vm4 = vcmp.lt.s32.totalorder %v554_v55, 2 }
  0xef   : > { %vm2264_vm11 = vcmp.lt.s32.totalorder %v2263_v18, 0 }
  0xf0   : > { %v531_v44 = vsel %vm2264_vm11, 0, %v2263_v18  ;;  %v3194_v18 = vpop.permute.xlu0 %1416 }
  0xf1   : > { %v532_v52 = vsub.s32 32, %v531_v44  ;;  %v536_v53 = vsub.s32 4294967266, %v531_v44  ;;  %v533_v63 = vshll.u32 %v524_v24, %v531_v44  ;;  %v884_v24 = vld [vmem:[%s3545_s4 + $0x40] sm:$0xff] }
  0xf3   : > { %v534_v0 = vshrl.u32 %v516_v57, %v532_v52  ;;  %v537_v4 = vadd.s32 127, %v536_v53  ;;  %v3200_v52 = vpop.permute.xlu1 %1411 }
  0xf4   : > { %v2388_v6 = vpop.eup %2387 }
  0xf5   : > { %v2390_v32 = vpop.eup %2389  ;;  %v664_v7 = vxor.u32 2147483648, %v2388_v6  ;;  %v535_v33 = vor.u32 %v534_v0, %v533_v63  ;;  %v538_v38 = vshll.u32 %v537_v4, 23 }
  0xf6   : > { %v661_v56 = vxor.u32 2147483648, %v2390_v32 }
  0xf7   : > { %v665_v49 = vsel %vm663_vm12, %v664_v7, %v2390_v32  ;;  %v539_v17 = vor.u32 4788187, %v538_v38  ;;  %v542_v8 = vcvt.s32.f32 %v535_v33  ;;  %v3206_v63 = vpop.permute.xlu1 %1401 }
  0xf8   : > { %v662_v50 = vsel %vm660_vm13, %v2388_v6, %v661_v56 }
  0xf9   : > { %v666_v39 = vsel %vm659_vm14, %v662_v50, %v665_v49  ;;  %v540_v31 = vand.u32 2147483647, %v539_v17 }
  0xfa   : > { %v667_v60 = vsel %vm656_vm0, nan, %v666_v39  ;;  %v3230_v39 = vpop.f32.mrf.mxu1 }
  0xfb   : > { %1197 = vmatprep.subr.mxu1 %v667_v60  ;;  %v543_v43 = vmul.f32 %v542_v8, %v540_v31  ;;  %v3214_v32 = vpop.permute.xlu1 %1391 }
  0xfc   : > { %v3234_v60 = vpop.f32.mrf.mxu1 }
  0xfd   : > { %v544_v34 = vxor.u32 2147483648, %v543_v43 }
  0xff   : > { %v545_v45 = vsel %vm462_vm15, %v544_v34, %v543_v43  ;;  %v3220_v38 = vpop.permute.xlu1 %1381 }
 0x100   : > { %v548_v42 = vsel %vm461_vm1, %v2676_v15, %v545_v45  ;;  %v878_v15 = vld [vmem:[%s3545_s4 + $0x10] sm:$0xff] }
 0x101   : > { %2391 = vcosq.f32 %v548_v42 }
 0x102   : > { %2393 = vsinq.f32 %v548_v42 }
 0x103   : > { %v3228_v50 = vpop.permute.xlu1 %1371 }
 0x104   : > { %3569 = vst [vmem:[#allocation6_spill] sm:$0xff] %v3228_v50 }
 0x107   : > { %v1362_v43 = vpop.permute.xlu1 %1361 }
 0x10e   : > { %v2392_v9 = vpop.eup %2391 }
 0x10f   : > { %v2394_v12 = vpop.eup %2393  ;;  %v560_v11 = vxor.u32 2147483648, %v2392_v9 }
 0x110   : > { %v557_v13 = vxor.u32 2147483648, %v2394_v12 }
 0x111   : > { %v561_v16 = vsel %vm559_vm2, %v560_v11, %v2394_v12  ;;  %v1352_v11 = vpop.permute.xlu1 %1351 }
 0x112   : > { %v558_v22 = vsel %vm556_vm3, %v2392_v9, %v557_v13  ;;  %v1023_v46 = vpop.f32.mrf.mxu0 }
 0x113   : > { %v562_v35 = vsel %vm555_vm4, %v558_v22, %v561_v16 }
 0x114   : > { %v563_v20 = vsel %vm552_vm5, nan, %v562_v35  ;;  %v1025_v37 = vpop.f32.mrf.mxu0 }
 0x115   : > { %1198 = vmatpush1.msra.mxu1 %v563_v20 }
 0x116   : > { %2293 = vmatmul.mubr.msk.f32.vlgmr.msra.gmra.mxu1 %vm1118_vm6, %v876_v21 }
 0x117   : > { %1237 = vmatprep.mubr.f32.mxu1 %v2404_v47 }
 0x11a   : > { %2294 = vmatmul.mubr.msk.f32.gmra.mxu1 %vm1118_vm6, %v877_v1  ;;  %v1029_v40 = vpop.f32.mrf.mxu0 }
 0x11b   : > { %1243 = vmatprep.mubr.f32.mxu1 %v2404_v47 }
 0x11c   : > { %v1031_v48 = vpop.f32.mrf.mxu0 }
 0x11e   : > { %2295 = vmatmul.mubr.msk.f32.gmra.mxu1 %vm1118_vm6, %v878_v15 }
 0x11f   : > { %1249 = vmatprep.mubr.f32.mxu1 %v2404_v47 }
 0x122   : > { %2296 = vmatmul.mubr.msk.f32.gmra.mxu1 %vm1118_vm6, %v879_v3 }
 0x123   : > { %1255 = vmatprep.mubr.f32.mxu1 %v2404_v47 }
 0x126   : > { %2297 = vmatmul.mubr.msk.f32.gmra.mxu1 %vm1118_vm6, %v880_v51 }
 0x127   : > { %1261 = vmatprep.mubr.f32.mxu1 %v2404_v47 }
 0x12a   : > { %2298 = vmatmul.mubr.msk.f32.gmra.mxu1 %vm1118_vm6, %v881_v23 }
 0x12b   : > { %1267 = vmatprep.mubr.f32.mxu1 %v2404_v47 }
 0x12e   : > { %2299 = vmatmul.mubr.msk.f32.gmra.mxu1 %vm1118_vm6, %v882_v59 }
 0x12f   : > { %1273 = vmatprep.mubr.f32.mxu1 %v2404_v47 }
 0x132   : > { %2300 = vmatmul.mubr.msk.f32.gmra.mxu1 %vm1118_vm6, %v883_v5 }
 0x133   : > { %1279 = vmatprep.mubr.f32.mxu1 %v2404_v47 }
 0x136   : > { %2301 = vmatmul.mubr.msk.f32.gmra.mxu1 %vm1118_vm6, %v884_v24 }
 0x137   : > { %1285 = vmatprep.mubr.f32.mxu1 %v2404_v47 }
 0x13a   : > { %2302 = vmatmul.mubr.msk.f32.gmra.mxu1 %vm1118_vm6, %v885_v25 }
 0x13b   : > { %1291 = vmatprep.mubr.f32.mxu1 %v2404_v47 }
 0x13e   : > { %2303 = vmatmul.mubr.msk.f32.gmra.mxu1 %vm1118_vm6, %v886_v26 }
 0x13f   : > { %1297 = vmatprep.mubr.f32.mxu1 %v2404_v47 }
 0x142   : > { %2304 = vmatmul.mubr.msk.f32.gmra.mxu1 %vm1118_vm6, %v887_v27 }
 0x143   : > { %1303 = vmatprep.mubr.f32.mxu1 %v2404_v47 }
 0x146   : > { %2305 = vmatmul.mubr.msk.f32.gmra.mxu1 %vm1118_vm6, %v888_v28 }
 0x147   : > { %1309 = vmatprep.mubr.f32.mxu1 %v2404_v47 }
 0x14a   : > { %2306 = vmatmul.mubr.msk.f32.gmra.mxu1 %vm1118_vm6, %v889_v29  ;;  %v1035_v58 = vpop.f32.mrf.mxu0 }
 0x14b   : > { %1315 = vmatprep.mubr.f32.mxu1 %v2404_v47 }
 0x14c   : > { %v1037_v54 = vpop.f32.mrf.mxu0 }
 0x14e   : > { %2307 = vmatmul.mubr.msk.f32.gmra.mxu1 %vm1118_vm6, %v890_v36 }
 0x14f   : > { %1321 = vmatprep.mubr.f32.mxu1 %v2404_v47  ;;  %v3198_v47 = vpop.permute.xlu0 %1406 }
 0x152   : > { %2308 = vmatmul.mubr.msk.f32.gmra.mxu1 %vm1118_vm6, %v891_v19 }
 0x153   : > { %2017 = vmatprep.mubr.bf16.mxu1 %v3554_v2  ;;  %v3204_v61 = vpop.permute.xlu0 %1396 }
 0x156   : > { %v1041_v44 = vpop.f32.mrf.mxu0 }
 0x157   : > { %v3210_v4 = vpop.permute.xlu0 %1386 }
 0x158   : > { %v1043_v57 = vpop.f32.mrf.mxu0 }
 0x15a   : > { %v3202_v53 = vpop.f32.mrf.mxu0 }
 0x15b   : > { %3565 = vst [vmem:[#allocation2_spill] sm:$0xff] %v3202_v53  ;;  %v3218_v33 = vpop.permute.xlu0 %1376 }
 0x15c   : > { %v3208_v0 = vpop.f32.mrf.mxu0  ;;  %3567 = vst [vmem:[#allocation4_spill] sm:$0xff] %v3218_v33 }
 0x15f   : > { %v3224_v49 = vpop.permute.xlu0 %1366 }
 0x160   : > { %3568 = vst [vmem:[#allocation5_spill] sm:$0xff] %v3224_v49 }
 0x163   : > { %v1357_v8 = vpop.permute.xlu0 %1356 }
 0x167   : > { %v1347_v14 = vpop.permute.xlu0 %1346 }
 0x168   : > { %v3212_v6 = vpop.f32.mrf.mxu0 }
 0x169   : > { %3566 = vst [vmem:[#allocation3_spill] sm:$0xff] %v3212_v6 }
 0x16a   : > { %v3216_v7 = vpop.f32.mrf.mxu0 }
 0x16c   : > { %v3222_v56 = vpop.f32.mrf.mxu0 }
 0x16e   : > { %v3226_v17 = vpop.f32.mrf.mxu0 }
 0x170   : > { %v3232_v31 = vpop.f32.mrf.mxu0 }
 0x172   : > { %v3236_v30 = vpop.f32.mrf.mxu0 }
 0x174   : > { %v3238_v55 = vpop.f32.mrf.mxu0 }
 0x176   : > { %v3240_v20 = vpop.f32.mrf.mxu0 }
 0x178   : > { %v3244_v27 = vpop.f32.mrf.mxu0 }
 0x1d6   : > { %v1233_v34 = vpop.f32.mrf.mxu1 }
 0x1d7   : > { %v1234_v45 = vadd.f32 %v1233_v34, %v1023_v46 }
 0x1d8   : > { %v1235_v42 = vpop.f32.mrf.mxu1 }
 0x1d9   : > { %v1236_v62 = vadd.f32 %v1235_v42, %v1025_v37  ;;  %v1424_v9 = vadd.f32 %v1347_v14, %v1234_v45 }
 0x1da   : > { %v1239_v10 = vpop.f32.mrf.mxu1 }
 0x1db   : > { %v1240_v12 = vadd.f32 %v1239_v10, %v1029_v40  ;;  %v1425_v16 = vadd.f32 %v1347_v14, %v1236_v62  ;;  %v1456_v1 = vmax.f32 %v1424_v9, 0.0 }
 0x1dc   : > { %v1241_v13 = vpop.f32.mrf.mxu1 }
 0x1dd   : > { %v1426_v22 = vadd.f32 %v1352_v11, %v1240_v12  ;;  %v1242_v35 = vadd.f32 %v1241_v13, %v1031_v48  ;;  %v1457_v59 = vmax.f32 %v1425_v16, 0.0 }
 0x1de   : > { %v1245_v21 = vpop.f32.mrf.mxu1 }
 0x1df   : > { %v1458_v15 = vmax.f32 %v1426_v22, 0.0  ;;  %v1427_v3 = vadd.f32 %v1352_v11, %v1242_v35  ;;  %v1246_v51 = vadd.f32 %v1245_v21, %v1035_v58  ;;  %v1079_v58 = vpop.f32.mrf.mxu0 }
 0x1e0   : > { %v1247_v23 = vpop.f32.mrf.mxu1 }
 0x1e1   : > { %v3242_v5 = vpack.c.bf16 %v1458_v15, %v1456_v1  ;;  %v1459_v24 = vmax.f32 %v1427_v3, 0.0  ;;  %v1248_v25 = vadd.f32 %v1247_v23, %v1037_v54  ;;  %v1428_v28 = vadd.f32 %v1357_v8, %v1246_v51 }
 0x1e2   : > { %v1251_v26 = vpop.f32.mrf.mxu1 }
 0x1e3   : > { %3570 = vst [vmem:[#allocation7_spill] sm:$0xff] %v3242_v5  ;;  %v1252_v29 = vadd.f32 %v1251_v26, %v1041_v44  ;;  %v3246_v36 = vpack.c.bf16 %v1459_v24, %v1457_v59  ;;  %v1429_v46 = vadd.f32 %v1357_v8, %v1248_v25  ;;  %v1460_v34 = vmax.f32 %v1428_v28, 0.0  ;;  %v1083_v44 = vpop.f32.mrf.mxu0 }
 0x1e4   : > { %v1253_v19 = vpop.f32.mrf.mxu1 }
 0x1e5   : > { %3571 = vst [vmem:[#allocation8_spill] sm:$0xff] %v3246_v36  ;;  %v1430_v37 = vadd.f32 %v1362_v43, %v1252_v29  ;;  %v1254_v40 = vadd.f32 %v1253_v19, %v1043_v57  ;;  %v1461_v54 = vmax.f32 %v1429_v46, 0.0  ;;  %v1085_v11 = vpop.f32.mrf.mxu0 }
 0x1e6   : > { %v3248_v48 = vpop.f32.mrf.mxu1 }
 0x1e7   : > { %3572 = vst [vmem:[#allocation9_spill] sm:$0xff] %v3248_v48  ;;  %v1462_v45 = vmax.f32 %v1430_v37, 0.0  ;;  %v1431_v42 = vadd.f32 %v1362_v43, %v1254_v40  ;;  %v1089_v43 = vpop.f32.mrf.mxu0 }
 0x1e8   : > { %v3250_v14 = vpop.f32.mrf.mxu1 }
 0x1e9   : > { %3573 = vst [vmem:[#allocation10_spill] sm:$0xff] %v3250_v14  ;;  %v3252_v62 = vpack.c.bf16 %v1462_v45, %v1460_v34  ;;  %v1463_v10 = vmax.f32 %v1431_v42, 0.0  ;;  %v1091_v21 = vpop.f32.mrf.mxu0 }
 0x1ea   : > { %v3254_v9 = vpop.f32.mrf.mxu1 }
 0x1eb   : > { %3574 = vst [vmem:[#allocation11_spill] sm:$0xff] %v3252_v62  ;;  %3575 = vst [vmem:[#allocation12_spill] sm:$0xff] %v3254_v9  ;;  %v3256_v12 = vpack.c.bf16 %v1463_v10, %v1461_v54  ;;  %v1095_v3 = vpop.f32.mrf.mxu0 }
 0x1ec   : > { %v3258_v8 = vpop.f32.mrf.mxu1 }
 0x1ed   : > { %3576 = vst [vmem:[#allocation13_spill] sm:$0xff] %v3256_v12  ;;  %v1097_v59 = vpop.f32.mrf.mxu0 }
 0x1ee   : > { %v3260_v57 = vpop.f32.mrf.mxu1 }
 0x1ef   : > { %v1101_v26 = vpop.f32.mrf.mxu0 }
 0x1f0   : > { %v3262_v13 = vpop.f32.mrf.mxu1 }
 0x1f1   : > { %v1103_v19 = vpop.f32.mrf.mxu0 }
 0x1f2   : > { %v3264_v16 = vpop.f32.mrf.mxu1 }
 0x1f3   : > { %v1107_v40 = vpop.f32.mrf.mxu0 }
 0x1f4   : > { %v1277_v22 = vpop.f32.mrf.mxu1 }
 0x1f5   : > { %v1109_v42 = vpop.f32.mrf.mxu0 }
 0x1f6   : > { %v3266_v35 = vpop.f32.mrf.mxu1 }
 0x1f8   : > { %v1283_v1 = vpop.f32.mrf.mxu1 }
 0x1fa   : > { %v1287_v15 = vpop.f32.mrf.mxu1 }
 0x1fc   : > { %v1289_v51 = vpop.f32.mrf.mxu1 }
 0x1fe   : > { %v1293_v23 = vpop.f32.mrf.mxu1 }
 0x200   : > { %v1295_v24 = vpop.f32.mrf.mxu1 }
 0x202   : > { %v1299_v25 = vpop.f32.mrf.mxu1 }
 0x204   : > { %v1301_v28 = vpop.f32.mrf.mxu1 }
 0x205   : > { %v1302_v49 = vadd.f32 %v1301_v28, %v1091_v21 }
 0x206   : > { %v1305_v29 = vpop.f32.mrf.mxu1 }
 0x207   : > { %v1306_v14 = vadd.f32 %v1305_v29, %v1095_v3  ;;  %v1447_v28 = vadd.f32 %v3206_v63, %v1302_v49  ;;  %v1278_v49 = vadd.f32 %v1277_v22, %v3236_v30  ;;  %v1276_v30 = vadd.f32 %v3264_v16, %v3232_v31  ;;  %v3577_v31 = vld [vmem:[#allocation10_spill] sm:$0xff] }
 0x208   : > { %v1307_v46 = vpop.f32.mrf.mxu1  ;;  %v1260_v16 = vadd.f32 %v3577_v31, %v3208_v0 }
 0x209   : > { %v1308_v62 = vadd.f32 %v1307_v46, %v1097_v59 }
 0x20a   : > { %v1311_v37 = vpop.f32.mrf.mxu1 }
 0x20b   : > { %v1312_v48 = vadd.f32 %v1311_v37, %v1101_v26  ;;  %v1294_v37 = vadd.f32 %v1293_v23, %v1083_v44  ;;  %v3579_v23 = vld [vmem:[#allocation3_spill] sm:$0xff] }
 0x20c   : > { %v1313_v34 = vpop.f32.mrf.mxu1 }
 0x20d   : > { %v1314_v10 = vadd.f32 %v1313_v34, %v1103_v19  ;;  %v1296_v34 = vadd.f32 %v1295_v24, %v1085_v11  ;;  %v1450_v21 = vadd.f32 %v3200_v52, %v1312_v48  ;;  %v1438_v24 = vadd.f32 %v3220_v38, %v1276_v30 }
 0x20e   : > { %v1317_v45 = vpop.f32.mrf.mxu1 }
 0x20f   : > { %v1318_v5 = vadd.f32 %v1317_v45, %v1107_v40  ;;  %v1451_v50 = vadd.f32 %v3200_v52, %v1314_v10  ;;  %v1449_v40 = vadd.f32 %v3198_v47, %v1308_v62  ;;  %v3581_v45 = vld [vmem:[#allocation6_spill] sm:$0xff] }
 0x210   : > { %v1319_v54 = vpop.f32.mrf.mxu1 }
 0x211   : > { %v1320_v2 = vadd.f32 %v1319_v54, %v1109_v42  ;;  %v1452_v19 = vadd.f32 %v3194_v18, %v1318_v5  ;;  %v1445_v5 = vadd.f32 %v3204_v61, %v1296_v34  ;;  %v1481_v62 = vmax.f32 %v1449_v40, 0.0  ;;  %v3582_v42 = vld [vmem:[#allocation2_spill] sm:$0xff]  ;;  %v3583_v54 = vld [vmem:[#allocation9_spill] sm:$0xff] }
 0x212   : > { %v1323_v36 = vpop.f32.mrf.mxu1  ;;  %v1258_v10 = vadd.f32 %v3583_v54, %v3582_v42  ;;  %v3584_v34 = vld [vmem:[#allocation5_spill] sm:$0xff] }
 0x213   : > { %v1324_v12 = vadd.f32 %v1323_v36, %v3230_v39  ;;  %v1453_v9 = vadd.f32 %v3194_v18, %v1320_v2  ;;  %v1290_v39 = vadd.f32 %v1289_v51, %v1079_v58  ;;  %v1300_v36 = vadd.f32 %v1299_v25, %v1089_v43 }
 0x214   : > { %v1325_v53 = vpop.f32.mrf.mxu1  ;;  %v1483_v2 = vmax.f32 %v1451_v50, 0.0  ;;  %v1284_v18 = vadd.f32 %v1283_v1, %v3240_v20  ;;  %v1479_v58 = vmax.f32 %v1447_v28, 0.0  ;;  %v1282_v20 = vadd.f32 %v3266_v35, %v3238_v55 }
 0x215   : > { %v1454_v6 = vadd.f32 %v3196_v41, %v1324_v12  ;;  %v1326_v33 = vadd.f32 %v1325_v53, %v3234_v60  ;;  %v1485_v46 = vmax.f32 %v1453_v9, 0.0  ;;  %v1448_v53 = vadd.f32 %v3198_v47, %v1306_v14 }
 0x216   : > { %v1484_v60 = vmax.f32 %v1452_v19, 0.0  ;;  %v1446_v52 = vadd.f32 %v3206_v63, %v1300_v36  ;;  %v1443_v50 = vadd.f32 %v3214_v32, %v1290_v39  ;;  %v1517_v47 = vpack.c.bf16 %v1483_v2, %v1481_v62  ;;  %v3586_v62 = vld [vmem:[#allocation11_spill] sm:$0xff] }
 0x217   : > { %v1455_v59 = vadd.f32 %v3196_v41, %v1326_v33  ;;  %v1486_v26 = vmax.f32 %v1454_v6, 0.0  ;;  %v1288_v33 = vadd.f32 %v1287_v15, %v3244_v27  ;;  %v1482_v6 = vmax.f32 %v1450_v21, 0.0 }
 0x218   : > { %v1444_v14 = vadd.f32 %v3204_v61, %v1294_v37  ;;  %v1480_v9 = vmax.f32 %v1448_v53, 0.0  ;;  %v1272_v27 = vadd.f32 %v3262_v13, %v3226_v17  ;;  %v1441_v63 = vadd.f32 %v3210_v4, %v1284_v18 }
 0x219   : > { %v1487_v12 = vmax.f32 %v1455_v59, 0.0  ;;  %v1518_v48 = vpack.c.bf16 %v1486_v26, %v1484_v60  ;;  %v1477_v44 = vmax.f32 %v1445_v5, 0.0  ;;  %v1442_v11 = vadd.f32 %v3214_v32, %v1288_v33  ;;  %v3578_v32 = vld [vmem:[#allocation4_spill] sm:$0xff]  ;;  %v3585_v5 = vld [vmem:[#allocation13_spill] sm:$0xff]  ;;  %v2363_v33 = vld [vmem:[%s3547_s6] sm:$0xff]  }
 0x21a   : > { %v1478_v43 = vmax.f32 %v1446_v52, 0.0  ;;  %v1516_v22 = vpack.c.bf16 %v1482_v6, %v1480_v9  ;;  %v1266_v55 = vadd.f32 %v3258_v8, %v3216_v7  ;;  %v1439_v61 = vadd.f32 %v3220_v38, %v1278_v49  ;;  %v3580_v7 = vld [vmem:[#allocation12_spill] sm:$0xff]  ;;  %v3588_v52 = vld [vmem:[#allocation7_spill] sm:$0xff]  ;;  %v3349_v9 = vpop.permute.xlu0 %1608 }
 0x21b   : > { %v1519_v41 = vpack.c.bf16 %v1487_v12, %v1485_v46  ;;  %v1475_v35 = vmax.f32 %v1443_v50, 0.0  ;;  %v1515_v1 = vpack.c.bf16 %v1479_v58, %v1477_v44  ;;  %v1270_v17 = vadd.f32 %v3260_v57, %v3222_v56  ;;  %v2365_v49 = vld [vmem:[%s3547_s6 + $0x10] sm:$0xff]   ;;  %v2366_v50 = vld [vmem:[%s3547_s6 + $0x18] sm:$0xff]   ;;  %v2367_v58 = vld [vmem:[%s3547_s6 + $0x20] sm:$0xff]  }
 0x21c   : > { %v1440_v13 = vadd.f32 %v3210_v4, %v1282_v20  ;;  %v1476_v15 = vmax.f32 %v1444_v14, 0.0  ;;  %v1437_v3 = vadd.f32 %v3578_v32, %v1272_v27  ;;  %v1473_v51 = vmax.f32 %v1441_v63, 0.0  ;;  %v2369_v20 = vld [vmem:[%s3547_s6 + $0x30] sm:$0xff]   ;;  %v2370_v14 = vld [vmem:[%s3547_s6 + $0x38] sm:$0xff]   ;;  %v3351_v27 = vpop.permute.xlu1 %1613 }
 0x21d   : > { %1664 = vmatprep.subr.bf16.mxu0 %v1519_v41  ;;  %v1264_v8 = vadd.f32 %v3580_v7, %v3579_v23  ;;  %v1474_v25 = vmax.f32 %v1442_v11, 0.0  ;;  %v1435_v56 = vadd.f32 %v3581_v45, %v1266_v55  ;;  %v1471_v57 = vmax.f32 %v1439_v61, 0.0  ;;  %v3587_v41 = vld [vmem:[#allocation8_spill] sm:$0xff] }
 0x21e   : > { %1665 = vmatpush1.bf16.msra.mxu0 %v1518_v48  ;;  %v1514_v29 = vpack.c.bf16 %v1478_v43, %v1476_v15  ;;  %v1513_v4 = vpack.c.bf16 %v1475_v35, %v1473_v51  ;;  %v1436_v0 = vadd.f32 %v3578_v32, %v1270_v17  ;;  %v1472_v19 = vmax.f32 %v1440_v13, 0.0  ;;  %v2364_v48 = vld [vmem:[%s3547_s6 + $0x8] sm:$0xff]   ;;  %v3353_v63 = vpop.permute.xlu0 %1598 }
 0x21f   : > { %1666 = vmatprep.subr.bf16.mxu0 %v1517_v47  ;;  %v1433_v40 = vadd.f32 %v3584_v34, %v1260_v16  ;;  %v1469_v59 = vmax.f32 %v1437_v3, 0.0  ;;  %v1434_v39 = vadd.f32 %v3581_v45, %v1264_v8  ;;  %v1470_v38 = vmax.f32 %v1438_v24, 0.0  ;;  %v2368_v47 = vld [vmem:[%s3547_s6 + $0x28] sm:$0xff]  }
 0x220   : > { %v1512_v36 = vpack.c.bf16 %v1474_v25, %v1472_v19  ;;  %v1467_v21 = vmax.f32 %v1435_v56, 0.0  ;;  %v1432_v28 = vadd.f32 %v3584_v34, %v1258_v10  ;;  %v1468_v2 = vmax.f32 %v1436_v0, 0.0  ;;  %v3355_v44 = vpop.permute.xlu1 %1603 }
 0x221   : > { %v1511_v26 = vpack.c.bf16 %v1471_v57, %v1469_v59  ;;  %v1465_v46 = vmax.f32 %v1433_v40, 0.0  ;;  %v1466_v12 = vmax.f32 %v1434_v39, 0.0  ;;  %v3589_v6 = vmov 0  }
 0x222   : > { %1667 = vmatpush1.bf16.msra.mxu0 %v1516_v22  ;;  %v1510_v37 = vpack.c.bf16 %v1470_v38, %v1468_v2  ;;  %v1464_v60 = vmax.f32 %v1432_v28, 0.0  ;;  %v3357_v30 = vpop.permute.xlu0 %1588 }
 0x223   : > { %1668 = vmatprep.subr.bf16.mxu0 %v1515_v1  ;;  %v1509_v53 = vpack.c.bf16 %v1467_v21, %v1465_v46 }
 0x224   : > { %v1508_v18 = vpack.c.bf16 %v1466_v12, %v1464_v60  ;;  %v3359_v11 = vpop.permute.xlu1 %1593 }
 0x226   : > { %1669 = vmatpush1.bf16.msra.mxu0 %v1514_v29  ;;  %v3361_v43 = vpop.permute.xlu0 %1578 }
 0x227   : > { %1670 = vmatprep.subr.bf16.mxu0 %v1513_v4 }
 0x228   : > { %v3363_v22 = vpop.permute.xlu1 %1583 }
 0x22a   : > { %1671 = vmatpush1.bf16.msra.mxu0 %v1512_v36  ;;  %v3365_v55 = vpop.permute.xlu0 %1568 }
 0x22b   : > { %1672 = vmatprep.subr.bf16.mxu0 %v1511_v26 }
 0x22c   : > { %v3367_v61 = vpop.permute.xlu1 %1573 }
 0x22e   : > { %1673 = vmatpush1.bf16.msra.mxu0 %v1510_v37  ;;  %v3369_v35 = vpop.permute.xlu0 %1558 }
 0x22f   : > { %1674 = vmatprep.subr.bf16.mxu0 %v1509_v53 }
 0x230   : > { %v3371_v1 = vpop.permute.xlu1 %1563 }
 0x232   : > { %1675 = vmatpush1.bf16.msra.mxu0 %v1508_v18  ;;  %v1549_v17 = vpop.permute.xlu0 %1548 }
 0x233   : > { %1676 = vmatprep.subr.bf16.mxu0 %v3585_v5 }
 0x234   : > { %v1554_v13 = vpop.permute.xlu1 %1553 }
 0x236   : > { %1677 = vmatpush1.bf16.msra.mxu0 %v3586_v62  ;;  %v1539_v31 = vpop.permute.xlu0 %1538 }
 0x237   : > { %1678 = vmatprep.subr.bf16.mxu0 %v3587_v41 }
 0x238   : > { %v1544_v3 = vpop.permute.xlu1 %1543 }
 0x23a   : > { %1679 = vmatpush1.bf16.msra.mxu0 %v3588_v52 }
 0x23d   : > { %1697 = vmatmul.mubr.bf16.vlgmr.msra.gmra.mxu0 %v2363_v33 }
 0x23e   : > { %1706 = vmatprep.mubr.bf16.mxu0 %v3589_v6 }
 0x245   : > { %1707 = vmatmul.mubr.bf16.gmra.mxu0 %v2364_v48 }
 0x246   : > { %1716 = vmatprep.mubr.bf16.mxu0 %v3589_v6 }
 0x24d   : > { %1717 = vmatmul.mubr.bf16.gmra.mxu0 %v2365_v49 }
 0x24e   : > { %1726 = vmatprep.mubr.bf16.mxu0 %v3589_v6 }
 0x255   : > { %1727 = vmatmul.mubr.bf16.gmra.mxu0 %v2366_v50 }
 0x256   : > { %1736 = vmatprep.mubr.bf16.mxu0 %v3589_v6 }
 0x25d   : > { %1737 = vmatmul.mubr.bf16.gmra.mxu0 %v2367_v58 }
 0x25e   : > { %1746 = vmatprep.mubr.bf16.mxu0 %v3589_v6 }
 0x265   : > { %1747 = vmatmul.mubr.bf16.gmra.mxu0 %v2368_v47 }
 0x266   : > { %1756 = vmatprep.mubr.bf16.mxu0 %v3589_v6 }
 0x26d   : > { %1757 = vmatmul.mubr.bf16.gmra.mxu0 %v2369_v20 }
 0x26e   : > { %1766 = vmatprep.mubr.bf16.mxu0 %v3589_v6 }
 0x275   : > { %1767 = vmatmul.mubr.bf16.gmra.mxu0 %v2370_v14 }
 0x276   : > { %2185 = vmatprep.mubr.bf16.mxu0 %v3589_v6 }
 0x2fd   : > { %v1698_v15 = vpop.f32.mrf.mxu0 }
 0x2fe   : > { %v1699_v32 = vadd.f32 %v1698_v15, %v1539_v31 }
 0x2ff   : > { %v1700_v16 = vpop.f32.mrf.mxu0 }
 0x300   : > { %v1701_v23 = vadd.f32 %v1700_v16, %v1539_v31  ;;  %v1777_v24 = vmax.f32 %v1699_v32, 0.0 }
 0x301   : > { %v1702_v51 = vpop.f32.mrf.mxu0 }
 0x302   : > { %v1703_v7 = vadd.f32 %v1702_v51, %v1544_v3  ;;  %v1778_v56 = vmax.f32 %v1701_v23, 0.0 }
 0x303   : > { %v1704_v8 = vpop.f32.mrf.mxu0 }
 0x304   : > { %v1779_v25 = vmax.f32 %v1703_v7, 0.0  ;;  %v1705_v29 = vadd.f32 %v1704_v8, %v1544_v3 }
 0x305   : > { %v1708_v45 = vpop.f32.mrf.mxu0 }
 0x306   : > { %v3373_v57 = vpack.c.bf16 %v1779_v25, %v1777_v24  ;;  %v1780_v4 = vmax.f32 %v1705_v29, 0.0  ;;  %v1709_v10 = vadd.f32 %v1708_v45, %v1549_v17 }
 0x307   : > { %v1710_v42 = vpop.f32.mrf.mxu0 }
 0x308   : > { %v3375_v54 = vpack.c.bf16 %v1780_v4, %v1778_v56  ;;  %v1711_v19 = vadd.f32 %v1710_v42, %v1549_v17  ;;  %v1781_v59 = vmax.f32 %v1709_v10, 0.0 }
 0x309   : > { %v1712_v0 = vpop.f32.mrf.mxu0 }
 0x30a   : > { %v1713_v34 = vadd.f32 %v1712_v0, %v1554_v13  ;;  %v1782_v21 = vmax.f32 %v1711_v19, 0.0 }
 0x30b   : > { %v1714_v40 = vpop.f32.mrf.mxu0 }
 0x30c   : > { %v1783_v39 = vmax.f32 %v1713_v34, 0.0  ;;  %v1715_v38 = vadd.f32 %v1714_v40, %v1554_v13 }
 0x30d   : > { %v3377_v36 = vpop.f32.mrf.mxu0 }
 0x30e   : > { %v3379_v26 = vpack.c.bf16 %v1783_v39, %v1781_v59  ;;  %v1784_v28 = vmax.f32 %v1715_v38, 0.0 }
 0x30f   : > { %v3381_v2 = vpop.f32.mrf.mxu0 }
 0x310   : > { %v3383_v46 = vpack.c.bf16 %v1784_v28, %v1782_v21 }
 0x311   : > { %v3385_v12 = vpop.f32.mrf.mxu0 }
 0x313   : > { %v3387_v37 = vpop.f32.mrf.mxu0 }
 0x315   : > { %v3389_v53 = vpop.f32.mrf.mxu0 }
 0x317   : > { %v1730_v60 = vpop.f32.mrf.mxu0 }
 0x319   : > { %v1732_v18 = vpop.f32.mrf.mxu0 }
 0x31b   : > { %v1734_v5 = vpop.f32.mrf.mxu0 }
 0x31d   : > { %v1738_v62 = vpop.f32.mrf.mxu0 }
 0x31f   : > { %v1740_v41 = vpop.f32.mrf.mxu0 }
 0x321   : > { %v1742_v33 = vpop.f32.mrf.mxu0 }
 0x323   : > { %v1744_v52 = vpop.f32.mrf.mxu0 }
 0x325   : > { %v1748_v48 = vpop.f32.mrf.mxu0 }
 0x326   : > { %v1749_v38 = vadd.f32 %v1748_v48, %v3357_v30 }
 0x327   : > { %v1750_v49 = vpop.f32.mrf.mxu0 }
 0x328   : > { %v1751_v0 = vadd.f32 %v1750_v49, %v3357_v30  ;;  %v1743_v49 = vadd.f32 %v1742_v33, %v3363_v22  ;;  %v1731_v30 = vadd.f32 %v1730_v60, %v3365_v55 }
 0x329   : > { %v1752_v50 = vpop.f32.mrf.mxu0 }
 0x32a   : > { %v1753_v34 = vadd.f32 %v1752_v50, %v3359_v11  ;;  %v1798_v28 = vmax.f32 %v1751_v0, 0.0  ;;  %v1790_v60 = vmax.f32 %v1731_v30, 0.0 }
 0x32b   : > { %v1754_v58 = vpop.f32.mrf.mxu0 }
 0x32c   : > { %v1755_v29 = vadd.f32 %v1754_v58, %v3359_v11  ;;  %v1799_v58 = vmax.f32 %v1753_v34, 0.0  ;;  %v1735_v11 = vadd.f32 %v1734_v5, %v3367_v61  ;;  %v1729_v5 = vadd.f32 %v3389_v53, %v3365_v55 }
 0x32d   : > { %v1758_v47 = vpop.f32.mrf.mxu0 }
 0x32e   : > { %v1759_v42 = vadd.f32 %v1758_v47, %v3353_v63  ;;  %v1792_v33 = vmax.f32 %v1735_v11, 0.0 }
 0x32f   : > { %v1760_v20 = vpop.f32.mrf.mxu0 }
 0x330   : > { %v1761_v7 = vadd.f32 %v1760_v20, %v3353_v63  ;;  %v1801_v21 = vmax.f32 %v1759_v42, 0.0  ;;  %v1741_v63 = vadd.f32 %v1740_v41, %v3361_v43  ;;  %v1733_v41 = vadd.f32 %v1732_v18, %v3367_v61 }
 0x331   : > { %v1762_v14 = vpop.f32.mrf.mxu0  ;;  %v1723_v61 = vadd.f32 %v3385_v12, %v3371_v1  ;;  %v2378_v12 = vld [vmem:[%s3549_s8 + $0x38] sm:$0xff]  }
 0x332   : > { %v1763_v24 = vadd.f32 %v1762_v14, %v3355_v44  ;;  %v1802_v19 = vmax.f32 %v1761_v7, 0.0  ;;  %v1797_v14 = vmax.f32 %v1749_v38, 0.0  ;;  %v1794_v48 = vmax.f32 %v1741_v63, 0.0 }
 0x333   : > { %v1764_v17 = vpop.f32.mrf.mxu0  ;;  %v1791_v18 = vmax.f32 %v1733_v41, 0.0  ;;  %v1787_v53 = vmax.f32 %v1723_v61, 0.0 }
 0x334   : > { %v1765_v16 = vadd.f32 %v1764_v17, %v3355_v44  ;;  %v1803_v40 = vmax.f32 %v1763_v24, 0.0  ;;  %v1800_v44 = vmax.f32 %v1755_v29, 0.0  ;;  %v1795_v17 = vmax.f32 %v1743_v49, 0.0  ;;  %v3457_v24 = vpop.permute.xlu1 %1934 }
 0x335   : > { %v1768_v13 = vpop.f32.mrf.mxu0 }
 0x336   : > { %v1769_v51 = vadd.f32 %v1768_v13, %v3349_v9  ;;  %v1804_v45 = vmax.f32 %v1765_v16, 0.0  ;;  %v1837_v47 = vpack.c.bf16 %v1803_v40, %v1801_v21  ;;  %v1836_v20 = vpack.c.bf16 %v1800_v44, %v1798_v28 }
 0x337   : > { %v1770_v15 = vpop.f32.mrf.mxu0  ;;  %v1835_v13 = vpack.c.bf16 %v1799_v58, %v1797_v14 }
 0x338   : > { %v1771_v32 = vadd.f32 %v1770_v15, %v3349_v9  ;;  %v1805_v10 = vmax.f32 %v1769_v51, 0.0  ;;  %v1838_v39 = vpack.c.bf16 %v1804_v45, %v1802_v19  ;;  %v3461_v29 = vpop.permute.xlu1 %1924 }
 0x339   : > { %v1772_v31 = vpop.f32.mrf.mxu0 }
 0x33a   : > { %v1773_v3 = vadd.f32 %v1772_v31, %v3351_v27  ;;  %v1806_v56 = vmax.f32 %v1771_v32, 0.0  ;;  %v1832_v32 = vpack.c.bf16 %v1792_v33, %v1790_v60 }
 0x33b   : > { %v1774_v23 = vpop.f32.mrf.mxu0 }
 0x33c   : > { %v1775_v8 = vadd.f32 %v1774_v23, %v3351_v27  ;;  %v1807_v25 = vmax.f32 %v1773_v3, 0.0  ;;  %v1745_v27 = vadd.f32 %v1744_v52, %v3363_v22  ;;  %v1739_v52 = vadd.f32 %v1738_v62, %v3361_v43 }
 0x33d   : > { %v1725_v22 = vadd.f32 %v3387_v37, %v3371_v1  ;;  %v1721_v43 = vadd.f32 %v3381_v2, %v3369_v35  ;;  %v1719_v37 = vadd.f32 %v3377_v36, %v3369_v35  ;;  %v1789_v3 = vmax.f32 %v1729_v5, 0.0  ;;  %v2371_v35 = vld [vmem:[%s3549_s8] sm:$0xff]   ;;  %v2372_v1 = vld [vmem:[%s3549_s8 + $0x8] sm:$0xff]  }
 0x33e   : > { %v1808_v4 = vmax.f32 %v1775_v8, 0.0  ;;  %v1839_v59 = vpack.c.bf16 %v1807_v25, %v1805_v10  ;;  %v1796_v50 = vmax.f32 %v1745_v27, 0.0  ;;  %v1793_v31 = vmax.f32 %v1739_v52, 0.0  ;;  %v2375_v36 = vld [vmem:[%s3549_s8 + $0x20] sm:$0xff]   ;;  %v3455_v8 = vpop.permute.xlu0 %1929 }
 0x33f   : > { %v1788_v16 = vmax.f32 %v1725_v22, 0.0  ;;  %v1786_v55 = vmax.f32 %v1721_v43, 0.0  ;;  %v1831_v51 = vpack.c.bf16 %v1791_v18, %v1789_v3  ;;  %v1785_v2 = vmax.f32 %v1719_v37, 0.0 }
 0x340   : > { %v1840_v9 = vpack.c.bf16 %v1808_v4, %v1806_v56  ;;  %v1834_v15 = vpack.c.bf16 %v1796_v50, %v1794_v48  ;;  %v1833_v62 = vpack.c.bf16 %v1795_v17, %v1793_v31  ;;  %v3465_v56 = vpop.permute.xlu1 %1914 }
 0x341   : > { %v1830_v23 = vpack.c.bf16 %v1788_v16, %v1786_v55  ;;  %v1829_v7 = vpack.c.bf16 %v1787_v53, %v1785_v2 }
 0x342   : > { %1985 = vmatprep.subr.bf16.mxu1 %v1840_v9  ;;  %v3459_v25 = vpop.permute.xlu0 %1919 }
 0x343   : > { %1986 = vmatpush1.bf16.msra.mxu1 %v1839_v59 }
 0x344   : > { %1987 = vmatprep.subr.bf16.mxu1 %v1838_v39 }
 0x346   : > { %v3463_v45 = vpop.permute.xlu0 %1909 }
 0x347   : > { %1988 = vmatpush1.bf16.msra.mxu1 %v1837_v47 }
 0x348   : > { %1989 = vmatprep.subr.bf16.mxu1 %v1836_v20 }
 0x34a   : > { %v3467_v4 = vpop.permute.xlu0 %1899 }
 0x34b   : > { %1990 = vmatpush1.bf16.msra.mxu1 %v1835_v13 }
 0x34c   : > { %1991 = vmatprep.subr.bf16.mxu1 %v1834_v15 }
 0x34e   : > { %v3471_v42 = vpop.permute.xlu0 %1889 }
 0x34f   : > { %1992 = vmatpush1.bf16.msra.mxu1 %v1833_v62 }
 0x350   : > { %1993 = vmatprep.subr.bf16.mxu1 %v1832_v32 }
 0x352   : > { %v3475_v0 = vpop.permute.xlu0 %1879 }
 0x353   : > { %1994 = vmatpush1.bf16.msra.mxu1 %v1831_v51 }
 0x354   : > { %1995 = vmatprep.subr.bf16.mxu1 %v1830_v23 }
 0x356   : > { %v1870_v9 = vpop.permute.xlu0 %1869 }
 0x357   : > { %1996 = vmatpush1.bf16.msra.mxu1 %v1829_v7 }
 0x358   : > { %1997 = vmatprep.subr.bf16.mxu1 %v3383_v46  ;;  %v2377_v46 = vld [vmem:[%s3549_s8 + $0x30] sm:$0xff]  }
 0x35a   : > { %v1860_v59 = vpop.permute.xlu0 %1859 }
 0x35b   : > { %1998 = vmatpush1.bf16.msra.mxu1 %v3379_v26  ;;  %v2376_v26 = vld [vmem:[%s3549_s8 + $0x28] sm:$0xff]  }
 0x35c   : > { %1999 = vmatprep.subr.bf16.mxu1 %v3375_v54  ;;  %v2373_v54 = vld [vmem:[%s3549_s8 + $0x10] sm:$0xff]  }
 0x35f   : > { %2000 = vmatpush1.bf16.msra.mxu1 %v3373_v57  ;;  %v2374_v57 = vld [vmem:[%s3549_s8 + $0x18] sm:$0xff]  }
 0x362   : > { %2018 = vmatmul.mubr.bf16.vlgmr.msra.gmra.mxu1 %v2371_v35 }
 0x363   : > { %2027 = vmatprep.mubr.bf16.mxu1 %v3589_v6 }
 0x36a   : > { %2028 = vmatmul.mubr.bf16.gmra.mxu1 %v2372_v1 }
 0x36b   : > { %2037 = vmatprep.mubr.bf16.mxu1 %v3589_v6 }
 0x372   : > { %2038 = vmatmul.mubr.bf16.gmra.mxu1 %v2373_v54 }
 0x373   : > { %2047 = vmatprep.mubr.bf16.mxu1 %v3589_v6 }
 0x37a   : > { %2048 = vmatmul.mubr.bf16.gmra.mxu1 %v2374_v57 }
 0x37b   : > { %2057 = vmatprep.mubr.bf16.mxu1 %v3589_v6 }
 0x382   : > { %2058 = vmatmul.mubr.bf16.gmra.mxu1 %v2375_v36 }
 0x383   : > { %2067 = vmatprep.mubr.bf16.mxu1 %v3589_v6 }
 0x38a   : > { %2068 = vmatmul.mubr.bf16.gmra.mxu1 %v2376_v26 }
 0x38b   : > { %2077 = vmatprep.mubr.bf16.mxu1 %v3589_v6 }
 0x392   : > { %2078 = vmatmul.mubr.bf16.gmra.mxu1 %v2377_v46 }
 0x393   : > { %2087 = vmatprep.mubr.bf16.mxu1 %v3589_v6  ;;  %v3469_v6 = vpop.permute.xlu1 %1904 }
 0x397   : > { %v3473_v10 = vpop.permute.xlu1 %1894 }
 0x39a   : > { %2088 = vmatmul.mubr.bf16.gmra.mxu1 %v2378_v12 }
 0x39b   : > { %v3477_v19 = vpop.permute.xlu1 %1884 }
 0x39f   : > { %v1875_v34 = vpop.permute.xlu1 %1874 }
 0x3a3   : > { %v1865_v39 = vpop.permute.xlu1 %1864 }
 0x422   : > { %v2019_v40 = vpop.f32.mrf.mxu1 }
 0x423   : > { %v2020_v44 = vadd.f32 %v2019_v40, %v1860_v59 }
 0x424   : > { %v2021_v27 = vpop.f32.mrf.mxu1 }
 0x425   : > { %v2022_v21 = vadd.f32 %v2021_v27, %v1860_v59  ;;  %v2098_v49 = vmax.f32 %v2020_v44, 0.0 }
 0x426   : > { %v2023_v38 = vpop.f32.mrf.mxu1 }
 0x427   : > { %v2024_v63 = vadd.f32 %v2023_v38, %v1865_v39  ;;  %v2099_v50 = vmax.f32 %v2022_v21, 0.0 }
 0x428   : > { %v2025_v28 = vpop.f32.mrf.mxu1 }
 0x429   : > { %v2100_v58 = vmax.f32 %v2024_v63, 0.0  ;;  %v2026_v47 = vadd.f32 %v2025_v28, %v1865_v39 }
 0x42a   : > { %v2029_v11 = vpop.f32.mrf.mxu1 }
 0x42b   : > { %v3479_v20 = vpack.c.bf16 %v2100_v58, %v2098_v49  ;;  %v2101_v52 = vmax.f32 %v2026_v47, 0.0  ;;  %v2030_v48 = vadd.f32 %v2029_v11, %v1870_v9 }
 0x42c   : > { %v2031_v14 = vpop.f32.mrf.mxu1 }
 0x42d   : > { %v3481_v30 = vpack.c.bf16 %v2101_v52, %v2099_v50  ;;  %v2032_v17 = vadd.f32 %v2031_v14, %v1870_v9  ;;  %v2102_v33 = vmax.f32 %v2030_v48, 0.0 }
 0x42e   : > { %v2033_v41 = vpop.f32.mrf.mxu1 }
 0x42f   : > { %v2034_v13 = vadd.f32 %v2033_v41, %v1875_v34  ;;  %v2103_v43 = vmax.f32 %v2032_v17, 0.0 }
 0x430   : > { %v2035_v22 = vpop.f32.mrf.mxu1 }
 0x431   : > { %v2104_v15 = vmax.f32 %v2034_v13, 0.0  ;;  %v2036_v5 = vadd.f32 %v2035_v22, %v1875_v34 }
 0x432   : > { %v3483_v31 = vpop.f32.mrf.mxu1 }
 0x433   : > { %v3485_v60 = vpack.c.bf16 %v2104_v15, %v2102_v33  ;;  %v2105_v61 = vmax.f32 %v2036_v5, 0.0 }
 0x434   : > { %v3487_v18 = vpop.f32.mrf.mxu1 }
 0x435   : > { %v3489_v62 = vpack.c.bf16 %v2105_v61, %v2103_v43 }
 0x436   : > { %v3491_v16 = vpop.f32.mrf.mxu1 }
 0x438   : > { %v3493_v32 = vpop.f32.mrf.mxu1 }
 0x43a   : > { %v3495_v37 = vpop.f32.mrf.mxu1 }
 0x43c   : > { %v2051_v3 = vpop.f32.mrf.mxu1 }
 0x43e   : > { %v2053_v55 = vpop.f32.mrf.mxu1 }
 0x440   : > { %v2055_v53 = vpop.f32.mrf.mxu1 }
 0x442   : > { %v2059_v51 = vpop.f32.mrf.mxu1 }
 0x444   : > { %v2061_v23 = vpop.f32.mrf.mxu1 }
 0x446   : > { %v2063_v2 = vpop.f32.mrf.mxu1 }
 0x447   : > { %v2064_v61 = vadd.f32 %v2063_v2, %v3469_v6 }
 0x448   : > { %v2065_v7 = vpop.f32.mrf.mxu1 }
 0x44a   : > { %v2069_v35 = vpop.f32.mrf.mxu1 }
 0x44b   : > { %v2070_v15 = vadd.f32 %v2069_v35, %v3463_v45 }
 0x44c   : > { %v2071_v1 = vpop.f32.mrf.mxu1 }
 0x44d   : > { %v2072_v48 = vadd.f32 %v2071_v1, %v3463_v45  ;;  %v2052_v45 = vadd.f32 %v2051_v3, %v3471_v42 }
 0x44e   : > { %v2073_v54 = vpop.f32.mrf.mxu1 }
 0x44f   : > { %v2074_v17 = vadd.f32 %v2073_v54, %v3465_v56  ;;  %v2119_v43 = vmax.f32 %v2072_v48, 0.0  ;;  %v2111_v3 = vmax.f32 %v2052_v45, 0.0 }
 0x450   : > { %v2075_v57 = vpop.f32.mrf.mxu1 }
 0x451   : > { %v2076_v58 = vadd.f32 %v2075_v57, %v3465_v56  ;;  %v2120_v1 = vmax.f32 %v2074_v17, 0.0  ;;  %v2056_v56 = vadd.f32 %v2055_v53, %v3473_v10  ;;  %v2050_v53 = vadd.f32 %v3495_v37, %v3471_v42 }
 0x452   : > { %v2079_v36 = vpop.f32.mrf.mxu1 }
 0x453   : > { %v2080_v52 = vadd.f32 %v2079_v36, %v3459_v25  ;;  %v2113_v2 = vmax.f32 %v2056_v56, 0.0 }
 0x454   : > { %v2081_v26 = vpop.f32.mrf.mxu1 }
 0x455   : > { %v2082_v21 = vadd.f32 %v2081_v26, %v3459_v25  ;;  %v2122_v5 = vmax.f32 %v2080_v52, 0.0  ;;  %v2062_v25 = vadd.f32 %v2061_v23, %v3467_v4  ;;  %v2118_v26 = vmax.f32 %v2070_v15, 0.0 }
 0x456   : > { %v2083_v46 = vpop.f32.mrf.mxu1  ;;  %v2054_v23 = vadd.f32 %v2053_v55, %v3473_v10  ;;  %v2044_v10 = vadd.f32 %v3491_v16, %v3477_v19 }
 0x457   : > { %v2084_v28 = vadd.f32 %v2083_v46, %v3461_v29  ;;  %v2123_v41 = vmax.f32 %v2082_v21, 0.0  ;;  %v2115_v35 = vmax.f32 %v2062_v25, 0.0  ;;  %v2116_v46 = vmax.f32 %v2064_v61, 0.0 }
 0x458   : > { %v2085_v12 = vpop.f32.mrf.mxu1  ;;  %v2112_v55 = vmax.f32 %v2054_v23, 0.0  ;;  %v2108_v37 = vmax.f32 %v2044_v10, 0.0 }
 0x459   : > { %v2086_v59 = vadd.f32 %v2085_v12, %v3461_v29  ;;  %v2124_v13 = vmax.f32 %v2084_v28, 0.0  ;;  %v2121_v29 = vmax.f32 %v2076_v58, 0.0  ;;  %v2141_v12 = vpack.c.bf16 %v2120_v1, %v2118_v26 }
 0x45a   : > { %v2089_v9 = vpop.f32.mrf.mxu1 }
 0x45b   : > { %v2090_v39 = vadd.f32 %v2089_v9, %v3455_v8  ;;  %v2125_v47 = vmax.f32 %v2086_v59, 0.0  ;;  %v2143_v57 = vpack.c.bf16 %v2124_v13, %v2122_v5  ;;  %v2142_v36 = vpack.c.bf16 %v2121_v29, %v2119_v43 }
 0x45c   : > { %v2091_v34 = vpop.f32.mrf.mxu1  ;;  %v2138_v59 = vpack.c.bf16 %v2113_v2, %v2111_v3 }
 0x45d   : > { %v2092_v27 = vadd.f32 %v2091_v34, %v3455_v8  ;;  %v2126_v14 = vmax.f32 %v2090_v39, 0.0  ;;  %v2144_v33 = vpack.c.bf16 %v2125_v47, %v2123_v41 }
 0x45e   : > { %v2093_v40 = vpop.f32.mrf.mxu1 }
 0x45f   : > { %v2094_v44 = vadd.f32 %v2093_v40, %v3457_v24  ;;  %v2127_v11 = vmax.f32 %v2092_v27, 0.0  ;;  %v2110_v27 = vmax.f32 %v2050_v53, 0.0 }
 0x460   : > { %v2095_v38 = vpop.f32.mrf.mxu1 }
 0x461   : > { %v2096_v63 = vadd.f32 %v2095_v38, %v3457_v24  ;;  %v2128_v49 = vmax.f32 %v2094_v44, 0.0  ;;  %v2066_v24 = vadd.f32 %v2065_v7, %v3469_v6  ;;  %v2060_v7 = vadd.f32 %v2059_v51, %v3467_v4 }
 0x462   : > { %v2046_v6 = vadd.f32 %v3493_v32, %v3477_v19  ;;  %v2042_v4 = vadd.f32 %v3487_v18, %v3475_v0  ;;  %v2040_v32 = vadd.f32 %v3483_v31, %v3475_v0  ;;  %v2137_v44 = vpack.c.bf16 %v2112_v55, %v2110_v27  ;;  %v2130_v0 = vld [vmem:[%s3551_s10] sm:$0xf]  ;;  %v2151_v19 = vpop.permute.xlu0 %2150 }
 0x463   : > { %v2129_v50 = vmax.f32 %v2096_v63, 0.0  ;;  %v2145_v22 = vpack.c.bf16 %v2128_v49, %v2126_v14  ;;  %v2117_v54 = vmax.f32 %v2066_v24, 0.0  ;;  %v2114_v34 = vmax.f32 %v2060_v7, 0.0 }
 0x464   : > { %v2109_v40 = vmax.f32 %v2046_v6, 0.0  ;;  %v2107_v42 = vmax.f32 %v2042_v4, 0.0  ;;  %v2106_v39 = vmax.f32 %v2040_v32, 0.0 }
 0x465   : > { %v2146_v8 = vpack.c.bf16 %v2129_v50, %v2127_v11  ;;  %v2140_v9 = vpack.c.bf16 %v2117_v54, %v2115_v35  ;;  %v2139_v51 = vpack.c.bf16 %v2116_v46, %v2114_v34 }
 0x466   : > { %v2136_v18 = vpack.c.bf16 %v2109_v40, %v2107_v42  ;;  %v2135_v38 = vpack.c.bf16 %v2108_v37, %v2106_v39 }
 0x467   : > { %2153 = vmatprep.subr.bf16.mxu0 %v2146_v8 }
 0x468   : > { %2154 = vmatpush1.bf16.msra.mxu0 %v2145_v22 }
 0x469   : > { %2155 = vmatprep.subr.bf16.mxu0 %v2144_v33 }
 0x46c   : > { %2156 = vmatpush1.bf16.msra.mxu0 %v2143_v57 }
 0x46d   : > { %2157 = vmatprep.subr.bf16.mxu0 %v2142_v36 }
 0x470   : > { %2158 = vmatpush1.bf16.msra.mxu0 %v2141_v12 }
 0x471   : > { %2159 = vmatprep.subr.bf16.mxu0 %v2140_v9 }
 0x474   : > { %2160 = vmatpush1.bf16.msra.mxu0 %v2139_v51 }
 0x475   : > { %2161 = vmatprep.subr.bf16.mxu0 %v2138_v59 }
 0x478   : > { %2162 = vmatpush1.bf16.msra.mxu0 %v2137_v44 }
 0x479   : > { %2163 = vmatprep.subr.bf16.mxu0 %v2136_v18 }
 0x47c   : > { %2164 = vmatpush1.bf16.msra.mxu0 %v2135_v38 }
 0x47d   : > { %2165 = vmatprep.subr.bf16.mxu0 %v3489_v62 }
 0x480   : > { %2166 = vmatpush1.bf16.msra.mxu0 %v3485_v60 }
 0x481   : > { %2167 = vmatprep.subr.bf16.mxu0 %v3481_v30 }
 0x484   : > { %2168 = vmatpush1.bf16.msra.mxu0 %v3479_v20 }
 0x487   : > { %2186 = vmatmul.mubr.bf16.vlgmr.msra.gmra.mxu0 %v2130_v0 }
 0x547   : > { %v2187_v31 = vpop.f32.mrf.mxu0 }
 0x548   : > { %v2188_v16 = vadd.f32 %v2187_v31, %v2151_v19 }
 0x549   : > { %v2189_v62 = vpop.f32.mrf.mxu0 }
 0x54a   : > { %2194 = vst [vmem:[%s415_s20] sm:$0xff] %v2188_v16  ;;  %v2190_v60 = vadd.f32 %v2189_v62, %v2151_v19 }
 0x54b   : > { %v2191_v21 = vpop.f32.mrf.mxu0 }
 0x54c   : > { %2195 = vst [vmem:[%s415_s20 + $0x8] sm:$0xff] %v2190_v60 }
 0x54d   : > { %v2192_v30 = vpop.f32.mrf.mxu0 }
 0x54e PF: > { %s22_s21 = sadd.s32 1, %s2401_s21  }
 0x54f   : > { %p19_p4 = scmp.ge.s32.totalorder %s22_s21, 4  }
 0x551   :  { %21 = sbr.rel (!%p19_p4) target bundleno = 1 (0x1), region = 98 }

</bundles_post_ra>
